<compile_context>
chip_gen: v6e
topology: v6e:2x2x1
jax: 0.10.0
libtpu: 0.0.40
codegen_flags: <defaults>
</compile_context>

<pallas_src>
import jax
import jax.numpy as jnp
from jax import lax
from jax.experimental import pallas as pl
from jax.experimental.pallas import tpu as pltpu

# ---------------- model dims (small, consistent with a tiny "base" model) ----
B = 2        # batch (only element 0 is consumed by EmbeddingNet.forward)
S = 8        # sequence length (tokenizer output length)
D = 128      # hidden size
F = 4 * D    # MLP inner size
VOCAB = 256  # synthetic vocabulary
LN_EPS = 1e-5

# f32 slab layout (rows of width D):
#   rows 0..S-1 : positional embeddings
#   row  S      : LN1 gamma      row S+1 : LN1 beta
#   row  S+2    : LN2 gamma      row S+3 : LN2 beta
#   row  S+4    : MLP down-proj bias b2
#   rows S+5..  : zero padding (to a multiple of 8 sublanes)
SLAB_ROWS = 16
ROW_G1, ROW_BE1, ROW_G2, ROW_BE2, ROW_B2 = S, S + 1, S + 2, S + 3, S + 4

# bf16 fused weight layout, (D, 3D + D + F) = (128, 1024), lane offsets:
#   [0, 3D)       : Wqkv (1/sqrt(D) folded into the Wq third)
#   [3D, 4D)      : Wo
#   [4D, 4D + F)  : W1
BIGW_COLS = 3 * D + D + F


# ----------------------------- Pallas kernel --------------------------------
def encoder_kernel(ids_ref, tok_emb_hbm, bigw_ref, w2_ref, b1_ref, slab_ref,
                   out_ref, x_scratch, gather_sem):
    """Embedding gather + one transformer encoder layer; emits last row only.

    Refs:
      ids_ref     : (S,)             int32 token ids (SMEM, scalar prefetch)
      tok_emb_hbm : (VOCAB, D)  f32  token embedding table (stays in HBM)
      bigw_ref    : (D, 3D+D+F) bf16 fused {Wqkv | Wo | W1}
      w2_ref      : (F, D)      bf16 MLP down-projection
      b1_ref      : (1, F)      f32  MLP up bias
      slab_ref    : (16, D)     f32  packed [pos_emb(8) | g1 be1 g2 be2 b2 | pad]
      out_ref     : (1, D)      f32  last_hidden_state[0, -1, :]
      x_scratch   : (S, D)      f32  VMEM gather buffer
      gather_sem  : (S,)             DMA semaphores
    """
    # ---- embedding gather: S tiny row DMAs straight from the HBM table ----
    for i in range(S):
        pltpu.make_async_copy(tok_emb_hbm.at[pl.ds(ids_ref[i], 1), :],
                              x_scratch.at[pl.ds(i, 1), :],
                              gather_sem.at[i]).start()
    for i in range(S):
        pltpu.make_async_copy(tok_emb_hbm.at[pl.ds(ids_ref[i], 1), :],
                              x_scratch.at[pl.ds(i, 1), :],
                              gather_sem.at[i]).wait()

    x = x_scratch[...] + slab_ref[0:S, :]                       # (S, D) f32
    x_bf = x.astype(jnp.bfloat16)

    # ---- fused QKV projection: all S rows (K/V need them; Q uses only last) --
    qkv = jnp.dot(x_bf, bigw_ref[:, 0:3 * D],
                  preferred_element_type=jnp.float32)           # (S, 3D) f32
    q = qkv[S - 1:S, 0:D]                                       # (1, D)
    k = qkv[:, D:2 * D]                                         # (S, D)
    v = qkv[:, 2 * D:3 * D]                                     # (S, D)

    # ---- single-head attention for the last query row (scale folded in Wq) --
    # NOTE: contraction on dim 1 of both operands implies a K transpose; with
    # S=8 that is a single XLU vxpose and not on the critical path.
    scores = lax.dot_general(
        q.astype(jnp.bfloat16), k.astype(jnp.bfloat16),
        dimension_numbers=(((1,), (1,)), ((), ())),
        preferred_element_type=jnp.float32)                     # (1, S)
    m = jnp.max(scores, axis=-1, keepdims=True)
    p = jnp.exp(scores - m)
    # pl.reciprocal(approx=True): ~1e-3 rel. error vs exact softmax division.
    p = p * pl.reciprocal(jnp.sum(p, axis=-1, keepdims=True), approx=True)

    attn = jnp.dot(p.astype(jnp.bfloat16), v.astype(jnp.bfloat16),
                   preferred_element_type=jnp.float32)          # (1, D)
    attn_out = jnp.dot(attn.astype(jnp.bfloat16), bigw_ref[:, 3 * D:4 * D],
                       preferred_element_type=jnp.float32)      # (1, D)

    # ---- unpack small params from the f32 slab ----
    g1 = slab_ref[ROW_G1:ROW_G1 + 1, :]
    be1 = slab_ref[ROW_BE1:ROW_BE1 + 1, :]
    g2 = slab_ref[ROW_G2:ROW_G2 + 1, :]
    be2 = slab_ref[ROW_BE2:ROW_BE2 + 1, :]
    b2 = slab_ref[ROW_B2:ROW_B2 + 1, :]

    # ---- residual + layernorm 1 (f32, last row only) ----
    h = x[S - 1:S, :] + attn_out                                # (1, D)
    mu = jnp.mean(h, axis=-1, keepdims=True)
    var = jnp.mean(jnp.square(h - mu), axis=-1, keepdims=True)
    h = (h - mu) * lax.rsqrt(var + LN_EPS)
    h = h * g1 + be1

    # ---- MLP (GELU), bf16 operands / f32 accumulation, last row only ----
    ff = jnp.dot(h.astype(jnp.bfloat16), bigw_ref[:, 4 * D:4 * D + F],
                 preferred_element_type=jnp.float32) + b1_ref[...]   # (1, F)
    # TODO(synk): PyTorch nn.GELU defaults to exact erf; tanh approximation is
    # used since erf lowering is not guaranteed in Mosaic.
    ff = jax.nn.gelu(ff, approximate=True)
    ff = jnp.dot(ff.astype(jnp.bfloat16), w2_ref[...],
                 preferred_element_type=jnp.float32) + b2            # (1, D)

    # ---- residual + layernorm 2 (f32) ----
    h2 = h + ff
    mu2 = jnp.mean(h2, axis=-1, keepdims=True)
    var2 = jnp.mean(jnp.square(h2 - mu2), axis=-1, keepdims=True)
    h2 = (h2 - mu2) * lax.rsqrt(var2 + LN_EPS)
    h2 = h2 * g2 + be2

    out_ref[...] = h2.astype(out_ref.dtype)


@jax.jit
def base_model_last_token(token_ids_row, tok_emb, bigw, w2, b1, slab):
    """Fused embedding-gather + encoder layer for one sequence; returns (1, D)."""
    in_specs = [
        pl.BlockSpec(memory_space=pl.ANY),                      # tok_emb (HBM)
        pl.BlockSpec((D, BIGW_COLS), lambda i, ids: (0, 0)),    # fused bf16 W
        pl.BlockSpec((F, D), lambda i, ids: (0, 0)),            # w2  (bf16)
        pl.BlockSpec((1, F), lambda i, ids: (0, 0)),            # b1  (f32)
        pl.BlockSpec((SLAB_ROWS, D), lambda i, ids: (0, 0)),    # slab (f32)
    ]
    out_spec = pl.BlockSpec((1, D), lambda i, ids: (0, 0))

    flops = (2 * S * D * 3 * D      # fused QKV
             + 2 * D * S            # scores
             + 2 * S * D            # p @ V
             + 2 * D * D            # attn @ Wo
             + 2 * D * F + 2 * F * D)  # MLP
    bytes_accessed = (S * D * 4          # gathered embedding rows
                      + D * BIGW_COLS * 2
                      + F * D * 2
                      + F * 4
                      + SLAB_ROWS * D * 4
                      + D * 4)
    cost = pl.CostEstimate(flops=flops, transcendentals=S + F + 2,
                           bytes_accessed=bytes_accessed)

    return pl.pallas_call(
        encoder_kernel,
        out_shape=jax.ShapeDtypeStruct((1, D), jnp.float32),
        grid_spec=pltpu.PrefetchScalarGridSpec(
            num_scalar_prefetch=1,       # token ids -> SMEM
            grid=(1,),                   # single step
            in_specs=in_specs,
            out_specs=out_spec,
            scratch_shapes=[pltpu.VMEM((S, D), jnp.float32),
                            pltpu.SemaphoreType.DMA((S,))]),
        compiler_params=pltpu.CompilerParams(
            dimension_semantics=("arbitrary",)),
        cost_estimate=cost,
    )(token_ids_row, tok_emb, bigw, w2, b1, slab)


# ----------------------------- EmbeddingNet wrapper --------------------------
def init_params(key):
    ks = jax.random.split(key, 8)
    scale = 0.02
    tok_emb = scale * jax.random.normal(ks[0], (VOCAB, D), jnp.float32)
    pos_emb = scale * jax.random.normal(ks[1], (S, D), jnp.float32)
    wq = scale * jax.random.normal(ks[2], (D, D), jnp.float32)
    wk = scale * jax.random.normal(ks[3], (D, D), jnp.float32)
    wv = scale * jax.random.normal(ks[4], (D, D), jnp.float32)
    wo = scale * jax.random.normal(ks[5], (D, D), jnp.float32)
    w1 = scale * jax.random.normal(ks[6], (D, F), jnp.float32)
    b1 = jnp.zeros((1, F), jnp.float32)
    w2 = scale * jax.random.normal(ks[7], (F, D), jnp.float32)
    b2 = jnp.zeros((1, D), jnp.float32)
    g1 = jnp.ones((1, D), jnp.float32)
    be1 = jnp.zeros((1, D), jnp.float32)
    g2 = jnp.ones((1, D), jnp.float32)
    be2 = jnp.zeros((1, D), jnp.float32)

    # Fold attention scale into Wq; fuse {Wqkv | Wo | W1}; cast MXU weights bf16.
    attn_scale = 1.0 / jnp.sqrt(jnp.float32(D))
    bigw = jnp.concatenate(
        [wq * attn_scale, wk, wv, wo, w1], axis=1).astype(jnp.bfloat16)
    w2_bf = w2.astype(jnp.bfloat16)

    # Pack pos_emb + the small (1, D) params into one (16, D) f32 slab.
    slab = jnp.zeros((SLAB_ROWS, D), jnp.float32)
    slab = slab.at[0:S].set(pos_emb)
    slab = (slab.at[ROW_G1].set(g1[0]).at[ROW_BE1].set(be1[0])
                .at[ROW_G2].set(g2[0]).at[ROW_BE2].set(be2[0])
                .at[ROW_B2].set(b2[0]))

    return tok_emb, (bigw, w2_bf, b1, slab)


def embedding_net_forward(token_ids, tok_emb, encoder_params):
    """EmbeddingNet.forward:
        output = tokenizer(x)          -> token_ids (done outside the kernel)
        output = base(**output)        -> fused Pallas embedding + encoder
        return output['last_hidden_state'][0, -1, :]
    """
    # TODO(synk): the HF text tokenizer (string -> token ids) has no Pallas
    # equivalent; the kernel consumes already-tokenized int32 ids.
    # TODO(synk): no attention/padding mask is applied; a real HF tokenizer
    # that pads sequences would need a mask before the [0, -1, :] slice.
    bigw, w2_bf, b1, slab = encoder_params
    last = base_model_last_token(token_ids[0], tok_emb, bigw, w2_bf, b1, slab)
    return last[0, :]                                           # (D,)


# --------------------------------- main --------------------------------------
if __name__ == "__main__":
    key = jax.random.PRNGKey(0)
    k_tok, k_params = jax.random.split(key)

    # synthetic "tokenizer output": int32 token ids, shape (B, S)
    token_ids = jax.random.randint(k_tok, (B, S), 0, VOCAB, dtype=jnp.int32)

    tok_emb, encoder_params = init_params(k_params)

    emb = embedding_net_forward(token_ids, tok_emb, encoder_params)
    emb = jax.block_until_ready(emb)

    assert emb.shape == (D,) and emb.dtype == jnp.float32
    assert bool(jnp.all(jnp.isfinite(emb)))
    print("KERNEL_OK")
</pallas_src>

<mosaic_0001>
module attributes {stable_mosaic.version = 11 : i64} {
  func.func @encoder_kernel(%arg0: i32, %arg1: memref<8xi32, #tpu.memory_space<smem>>, %arg2: memref<256x128xf32, #tpu.memory_space<any>>, %arg3: memref<128x1024xbf16, #tpu.memory_space<vmem>>, %arg4: memref<512x128xbf16, #tpu.memory_space<vmem>>, %arg5: memref<1x512xf32, #tpu.memory_space<vmem>>, %arg6: memref<16x128xf32, #tpu.memory_space<vmem>>, %arg7: memref<1x128xf32, #tpu.memory_space<vmem>>, %arg8: memref<8x128xf32, #tpu.memory_space<vmem>>, %arg9: memref<8x!tpu.dma_semaphore, #tpu.memory_space<semaphore_mem>>) attributes {dimension_semantics = [#tpu.dimension_semantics<arbitrary>], iteration_bounds = array<i64: 1>, scalar_prefetch = 1 : i64, scratch_operands = 2 : i64, tpu.core_type = #tpu.core_type<tc>, window_params = [{}, {pipeline_mode = #tpu.pipeline_mode<synchronous>, transform_indices = @transform_1, window_bounds = array<i64: 128, 1024>}, {pipeline_mode = #tpu.pipeline_mode<synchronous>, transform_indices = @transform_2, window_bounds = array<i64: 512, 128>}, {pipeline_mode = #tpu.pipeline_mode<synchronous>, transform_indices = @transform_3, window_bounds = array<i64: 1, 512>}, {pipeline_mode = #tpu.pipeline_mode<synchronous>, transform_indices = @transform_4, window_bounds = array<i64: 16, 128>}, {pipeline_mode = #tpu.pipeline_mode<synchronous>, transform_indices = @transform_5, window_bounds = array<i64: 1, 128>}]} {
    %c0 = arith.constant 0 : index
    %0 = memref.load %arg1[%c0] : memref<8xi32, #tpu.memory_space<smem>>
    %c0_i32 = arith.constant 0 : i32
    %c0_i32_0 = arith.constant 0 : i32
    %1 = tpu.memref_slice %arg2[%0, %c0_i32_0] : memref<256x128xf32, #tpu.memory_space<any>> -> memref<1x128xf32, #tpu.memory_space<any>>
    %c0_i32_1 = arith.constant 0 : i32
    %c0_i32_2 = arith.constant 0 : i32
    %2 = tpu.memref_slice %arg8[%c0_i32_1, %c0_i32_2] : memref<8x128xf32, #tpu.memory_space<vmem>> -> memref<1x128xf32, #tpu.memory_space<vmem>>
    %3 = tpu.memref_slice %arg9[%c0_i32] : memref<8x!tpu.dma_semaphore, #tpu.memory_space<semaphore_mem>> -> memref<1x!tpu.dma_semaphore, #tpu.memory_space<semaphore_mem>>
    %4 = tpu.memref_squeeze %3 : memref<1x!tpu.dma_semaphore, #tpu.memory_space<semaphore_mem>> -> memref<!tpu.dma_semaphore, #tpu.memory_space<semaphore_mem>>
    tpu.enqueue_dma source(%1 : memref<1x128xf32, #tpu.memory_space<any>>) target(%2 : memref<1x128xf32, #tpu.memory_space<vmem>>) target_semaphore(%4 : memref<!tpu.dma_semaphore, #tpu.memory_space<semaphore_mem>>)
    %c1 = arith.constant 1 : index
    %5 = memref.load %arg1[%c1] : memref<8xi32, #tpu.memory_space<smem>>
    %c1_i32 = arith.constant 1 : i32
    %c0_i32_3 = arith.constant 0 : i32
    %6 = tpu.memref_slice %arg2[%5, %c0_i32_3] : memref<256x128xf32, #tpu.memory_space<any>> -> memref<1x128xf32, #tpu.memory_space<any>>
    %c1_i32_4 = arith.constant 1 : i32
    %c0_i32_5 = arith.constant 0 : i32
    %7 = tpu.memref_slice %arg8[%c1_i32_4, %c0_i32_5] : memref<8x128xf32, #tpu.memory_space<vmem>> -> memref<1x128xf32, #tpu.memory_space<vmem>>
    %8 = tpu.memref_slice %arg9[%c1_i32] : memref<8x!tpu.dma_semaphore, #tpu.memory_space<semaphore_mem>> -> memref<1x!tpu.dma_semaphore, #tpu.memory_space<semaphore_mem>>
    %9 = tpu.memref_squeeze %8 : memref<1x!tpu.dma_semaphore, #tpu.memory_space<semaphore_mem>> -> memref<!tpu.dma_semaphore, #tpu.memory_space<semaphore_mem>>
    tpu.enqueue_dma source(%6 : memref<1x128xf32, #tpu.memory_space<any>>) target(%7 : memref<1x128xf32, #tpu.memory_space<vmem>>) target_semaphore(%9 : memref<!tpu.dma_semaphore, #tpu.memory_space<semaphore_mem>>)
    %c2 = arith.constant 2 : index
    %10 = memref.load %arg1[%c2] : memref<8xi32, #tpu.memory_space<smem>>
    %c2_i32 = arith.constant 2 : i32
    %c0_i32_6 = arith.constant 0 : i32
    %11 = tpu.memref_slice %arg2[%10, %c0_i32_6] : memref<256x128xf32, #tpu.memory_space<any>> -> memref<1x128xf32, #tpu.memory_space<any>>
    %c2_i32_7 = arith.constant 2 : i32
    %c0_i32_8 = arith.constant 0 : i32
    %12 = tpu.memref_slice %arg8[%c2_i32_7, %c0_i32_8] : memref<8x128xf32, #tpu.memory_space<vmem>> -> memref<1x128xf32, #tpu.memory_space<vmem>>
    %13 = tpu.memref_slice %arg9[%c2_i32] : memref<8x!tpu.dma_semaphore, #tpu.memory_space<semaphore_mem>> -> memref<1x!tpu.dma_semaphore, #tpu.memory_space<semaphore_mem>>
    %14 = tpu.memref_squeeze %13 : memref<1x!tpu.dma_semaphore, #tpu.memory_space<semaphore_mem>> -> memref<!tpu.dma_semaphore, #tpu.memory_space<semaphore_mem>>
    tpu.enqueue_dma source(%11 : memref<1x128xf32, #tpu.memory_space<any>>) target(%12 : memref<1x128xf32, #tpu.memory_space<vmem>>) target_semaphore(%14 : memref<!tpu.dma_semaphore, #tpu.memory_space<semaphore_mem>>)
    %c3 = arith.constant 3 : index
    %15 = memref.load %arg1[%c3] : memref<8xi32, #tpu.memory_space<smem>>
    %c3_i32 = arith.constant 3 : i32
    %c0_i32_9 = arith.constant 0 : i32
    %16 = tpu.memref_slice %arg2[%15, %c0_i32_9] : memref<256x128xf32, #tpu.memory_space<any>> -> memref<1x128xf32, #tpu.memory_space<any>>
    %c3_i32_10 = arith.constant 3 : i32
    %c0_i32_11 = arith.constant 0 : i32
    %17 = tpu.memref_slice %arg8[%c3_i32_10, %c0_i32_11] : memref<8x128xf32, #tpu.memory_space<vmem>> -> memref<1x128xf32, #tpu.memory_space<vmem>>
    %18 = tpu.memref_slice %arg9[%c3_i32] : memref<8x!tpu.dma_semaphore, #tpu.memory_space<semaphore_mem>> -> memref<1x!tpu.dma_semaphore, #tpu.memory_space<semaphore_mem>>
    %19 = tpu.memref_squeeze %18 : memref<1x!tpu.dma_semaphore, #tpu.memory_space<semaphore_mem>> -> memref<!tpu.dma_semaphore, #tpu.memory_space<semaphore_mem>>
    tpu.enqueue_dma source(%16 : memref<1x128xf32, #tpu.memory_space<any>>) target(%17 : memref<1x128xf32, #tpu.memory_space<vmem>>) target_semaphore(%19 : memref<!tpu.dma_semaphore, #tpu.memory_space<semaphore_mem>>)
    %c4 = arith.constant 4 : index
    %20 = memref.load %arg1[%c4] : memref<8xi32, #tpu.memory_space<smem>>
    %c4_i32 = arith.constant 4 : i32
    %c0_i32_12 = arith.constant 0 : i32
    %21 = tpu.memref_slice %arg2[%20, %c0_i32_12] : memref<256x128xf32, #tpu.memory_space<any>> -> memref<1x128xf32, #tpu.memory_space<any>>
    %c4_i32_13 = arith.constant 4 : i32
    %c0_i32_14 = arith.constant 0 : i32
    %22 = tpu.memref_slice %arg8[%c4_i32_13, %c0_i32_14] : memref<8x128xf32, #tpu.memory_space<vmem>> -> memref<1x128xf32, #tpu.memory_space<vmem>>
    %23 = tpu.memref_slice %arg9[%c4_i32] : memref<8x!tpu.dma_semaphore, #tpu.memory_space<semaphore_mem>> -> memref<1x!tpu.dma_semaphore, #tpu.memory_space<semaphore_mem>>
    %24 = tpu.memref_squeeze %23 : memref<1x!tpu.dma_semaphore, #tpu.memory_space<semaphore_mem>> -> memref<!tpu.dma_semaphore, #tpu.memory_space<semaphore_mem>>
    tpu.enqueue_dma source(%21 : memref<1x128xf32, #tpu.memory_space<any>>) target(%22 : memref<1x128xf32, #tpu.memory_space<vmem>>) target_semaphore(%24 : memref<!tpu.dma_semaphore, #tpu.memory_space<semaphore_mem>>)
    %c5 = arith.constant 5 : index
    %25 = memref.load %arg1[%c5] : memref<8xi32, #tpu.memory_space<smem>>
    %c5_i32 = arith.constant 5 : i32
    %c0_i32_15 = arith.constant 0 : i32
    %26 = tpu.memref_slice %arg2[%25, %c0_i32_15] : memref<256x128xf32, #tpu.memory_space<any>> -> memref<1x128xf32, #tpu.memory_space<any>>
    %c5_i32_16 = arith.constant 5 : i32
    %c0_i32_17 = arith.constant 0 : i32
    %27 = tpu.memref_slice %arg8[%c5_i32_16, %c0_i32_17] : memref<8x128xf32, #tpu.memory_space<vmem>> -> memref<1x128xf32, #tpu.memory_space<vmem>>
    %28 = tpu.memref_slice %arg9[%c5_i32] : memref<8x!tpu.dma_semaphore, #tpu.memory_space<semaphore_mem>> -> memref<1x!tpu.dma_semaphore, #tpu.memory_space<semaphore_mem>>
    %29 = tpu.memref_squeeze %28 : memref<1x!tpu.dma_semaphore, #tpu.memory_space<semaphore_mem>> -> memref<!tpu.dma_semaphore, #tpu.memory_space<semaphore_mem>>
    tpu.enqueue_dma source(%26 : memref<1x128xf32, #tpu.memory_space<any>>) target(%27 : memref<1x128xf32, #tpu.memory_space<vmem>>) target_semaphore(%29 : memref<!tpu.dma_semaphore, #tpu.memory_space<semaphore_mem>>)
    %c6 = arith.constant 6 : index
    %30 = memref.load %arg1[%c6] : memref<8xi32, #tpu.memory_space<smem>>
    %c6_i32 = arith.constant 6 : i32
    %c0_i32_18 = arith.constant 0 : i32
    %31 = tpu.memref_slice %arg2[%30, %c0_i32_18] : memref<256x128xf32, #tpu.memory_space<any>> -> memref<1x128xf32, #tpu.memory_space<any>>
    %c6_i32_19 = arith.constant 6 : i32
    %c0_i32_20 = arith.constant 0 : i32
    %32 = tpu.memref_slice %arg8[%c6_i32_19, %c0_i32_20] : memref<8x128xf32, #tpu.memory_space<vmem>> -> memref<1x128xf32, #tpu.memory_space<vmem>>
    %33 = tpu.memref_slice %arg9[%c6_i32] : memref<8x!tpu.dma_semaphore, #tpu.memory_space<semaphore_mem>> -> memref<1x!tpu.dma_semaphore, #tpu.memory_space<semaphore_mem>>
    %34 = tpu.memref_squeeze %33 : memref<1x!tpu.dma_semaphore, #tpu.memory_space<semaphore_mem>> -> memref<!tpu.dma_semaphore, #tpu.memory_space<semaphore_mem>>
    tpu.enqueue_dma source(%31 : memref<1x128xf32, #tpu.memory_space<any>>) target(%32 : memref<1x128xf32, #tpu.memory_space<vmem>>) target_semaphore(%34 : memref<!tpu.dma_semaphore, #tpu.memory_space<semaphore_mem>>)
    %c7 = arith.constant 7 : index
    %35 = memref.load %arg1[%c7] : memref<8xi32, #tpu.memory_space<smem>>
    %c7_i32 = arith.constant 7 : i32
    %c0_i32_21 = arith.constant 0 : i32
    %36 = tpu.memref_slice %arg2[%35, %c0_i32_21] : memref<256x128xf32, #tpu.memory_space<any>> -> memref<1x128xf32, #tpu.memory_space<any>>
    %c7_i32_22 = arith.constant 7 : i32
    %c0_i32_23 = arith.constant 0 : i32
    %37 = tpu.memref_slice %arg8[%c7_i32_22, %c0_i32_23] : memref<8x128xf32, #tpu.memory_space<vmem>> -> memref<1x128xf32, #tpu.memory_space<vmem>>
    %38 = tpu.memref_slice %arg9[%c7_i32] : memref<8x!tpu.dma_semaphore, #tpu.memory_space<semaphore_mem>> -> memref<1x!tpu.dma_semaphore, #tpu.memory_space<semaphore_mem>>
    %39 = tpu.memref_squeeze %38 : memref<1x!tpu.dma_semaphore, #tpu.memory_space<semaphore_mem>> -> memref<!tpu.dma_semaphore, #tpu.memory_space<semaphore_mem>>
    tpu.enqueue_dma source(%36 : memref<1x128xf32, #tpu.memory_space<any>>) target(%37 : memref<1x128xf32, #tpu.memory_space<vmem>>) target_semaphore(%39 : memref<!tpu.dma_semaphore, #tpu.memory_space<semaphore_mem>>)
    %c0_24 = arith.constant 0 : index
    %40 = memref.load %arg1[%c0_24] : memref<8xi32, #tpu.memory_space<smem>>
    %c0_i32_25 = arith.constant 0 : i32
    %c0_i32_26 = arith.constant 0 : i32
    %41 = tpu.memref_slice %arg2[%40, %c0_i32_26] : memref<256x128xf32, #tpu.memory_space<any>> -> memref<1x128xf32, #tpu.memory_space<any>>
    %c0_i32_27 = arith.constant 0 : i32
    %c0_i32_28 = arith.constant 0 : i32
    %42 = tpu.memref_slice %arg8[%c0_i32_27, %c0_i32_28] : memref<8x128xf32, #tpu.memory_space<vmem>> -> memref<1x128xf32, #tpu.memory_space<vmem>>
    %43 = tpu.memref_slice %arg9[%c0_i32_25] : memref<8x!tpu.dma_semaphore, #tpu.memory_space<semaphore_mem>> -> memref<1x!tpu.dma_semaphore, #tpu.memory_space<semaphore_mem>>
    %44 = tpu.memref_squeeze %43 : memref<1x!tpu.dma_semaphore, #tpu.memory_space<semaphore_mem>> -> memref<!tpu.dma_semaphore, #tpu.memory_space<semaphore_mem>>
    tpu.wait_dma2 semaphore(%44 : memref<!tpu.dma_semaphore, #tpu.memory_space<semaphore_mem>>) src(%41 : memref<1x128xf32, #tpu.memory_space<any>>) dst(%42 : memref<1x128xf32, #tpu.memory_space<vmem>>)
    %c1_29 = arith.constant 1 : index
    %45 = memref.load %arg1[%c1_29] : memref<8xi32, #tpu.memory_space<smem>>
    %c1_i32_30 = arith.constant 1 : i32
    %c0_i32_31 = arith.constant 0 : i32
    %46 = tpu.memref_slice %arg2[%45, %c0_i32_31] : memref<256x128xf32, #tpu.memory_space<any>> -> memref<1x128xf32, #tpu.memory_space<any>>
    %c1_i32_32 = arith.constant 1 : i32
    %c0_i32_33 = arith.constant 0 : i32
    %47 = tpu.memref_slice %arg8[%c1_i32_32, %c0_i32_33] : memref<8x128xf32, #tpu.memory_space<vmem>> -> memref<1x128xf32, #tpu.memory_space<vmem>>
    %48 = tpu.memref_slice %arg9[%c1_i32_30] : memref<8x!tpu.dma_semaphore, #tpu.memory_space<semaphore_mem>> -> memref<1x!tpu.dma_semaphore, #tpu.memory_space<semaphore_mem>>
    %49 = tpu.memref_squeeze %48 : memref<1x!tpu.dma_semaphore, #tpu.memory_space<semaphore_mem>> -> memref<!tpu.dma_semaphore, #tpu.memory_space<semaphore_mem>>
    tpu.wait_dma2 semaphore(%49 : memref<!tpu.dma_semaphore, #tpu.memory_space<semaphore_mem>>) src(%46 : memref<1x128xf32, #tpu.memory_space<any>>) dst(%47 : memref<1x128xf32, #tpu.memory_space<vmem>>)
    %c2_34 = arith.constant 2 : index
    %50 = memref.load %arg1[%c2_34] : memref<8xi32, #tpu.memory_space<smem>>
    %c2_i32_35 = arith.constant 2 : i32
    %c0_i32_36 = arith.constant 0 : i32
    %51 = tpu.memref_slice %arg2[%50, %c0_i32_36] : memref<256x128xf32, #tpu.memory_space<any>> -> memref<1x128xf32, #tpu.memory_space<any>>
    %c2_i32_37 = arith.constant 2 : i32
    %c0_i32_38 = arith.constant 0 : i32
    %52 = tpu.memref_slice %arg8[%c2_i32_37, %c0_i32_38] : memref<8x128xf32, #tpu.memory_space<vmem>> -> memref<1x128xf32, #tpu.memory_space<vmem>>
    %53 = tpu.memref_slice %arg9[%c2_i32_35] : memref<8x!tpu.dma_semaphore, #tpu.memory_space<semaphore_mem>> -> memref<1x!tpu.dma_semaphore, #tpu.memory_space<semaphore_mem>>
    %54 = tpu.memref_squeeze %53 : memref<1x!tpu.dma_semaphore, #tpu.memory_space<semaphore_mem>> -> memref<!tpu.dma_semaphore, #tpu.memory_space<semaphore_mem>>
    tpu.wait_dma2 semaphore(%54 : memref<!tpu.dma_semaphore, #tpu.memory_space<semaphore_mem>>) src(%51 : memref<1x128xf32, #tpu.memory_space<any>>) dst(%52 : memref<1x128xf32, #tpu.memory_space<vmem>>)
    %c3_39 = arith.constant 3 : index
    %55 = memref.load %arg1[%c3_39] : memref<8xi32, #tpu.memory_space<smem>>
    %c3_i32_40 = arith.constant 3 : i32
    %c0_i32_41 = arith.constant 0 : i32
    %56 = tpu.memref_slice %arg2[%55, %c0_i32_41] : memref<256x128xf32, #tpu.memory_space<any>> -> memref<1x128xf32, #tpu.memory_space<any>>
    %c3_i32_42 = arith.constant 3 : i32
    %c0_i32_43 = arith.constant 0 : i32
    %57 = tpu.memref_slice %arg8[%c3_i32_42, %c0_i32_43] : memref<8x128xf32, #tpu.memory_space<vmem>> -> memref<1x128xf32, #tpu.memory_space<vmem>>
    %58 = tpu.memref_slice %arg9[%c3_i32_40] : memref<8x!tpu.dma_semaphore, #tpu.memory_space<semaphore_mem>> -> memref<1x!tpu.dma_semaphore, #tpu.memory_space<semaphore_mem>>
    %59 = tpu.memref_squeeze %58 : memref<1x!tpu.dma_semaphore, #tpu.memory_space<semaphore_mem>> -> memref<!tpu.dma_semaphore, #tpu.memory_space<semaphore_mem>>
    tpu.wait_dma2 semaphore(%59 : memref<!tpu.dma_semaphore, #tpu.memory_space<semaphore_mem>>) src(%56 : memref<1x128xf32, #tpu.memory_space<any>>) dst(%57 : memref<1x128xf32, #tpu.memory_space<vmem>>)
    %c4_44 = arith.constant 4 : index
    %60 = memref.load %arg1[%c4_44] : memref<8xi32, #tpu.memory_space<smem>>
    %c4_i32_45 = arith.constant 4 : i32
    %c0_i32_46 = arith.constant 0 : i32
    %61 = tpu.memref_slice %arg2[%60, %c0_i32_46] : memref<256x128xf32, #tpu.memory_space<any>> -> memref<1x128xf32, #tpu.memory_space<any>>
    %c4_i32_47 = arith.constant 4 : i32
    %c0_i32_48 = arith.constant 0 : i32
    %62 = tpu.memref_slice %arg8[%c4_i32_47, %c0_i32_48] : memref<8x128xf32, #tpu.memory_space<vmem>> -> memref<1x128xf32, #tpu.memory_space<vmem>>
    %63 = tpu.memref_slice %arg9[%c4_i32_45] : memref<8x!tpu.dma_semaphore, #tpu.memory_space<semaphore_mem>> -> memref<1x!tpu.dma_semaphore, #tpu.memory_space<semaphore_mem>>
    %64 = tpu.memref_squeeze %63 : memref<1x!tpu.dma_semaphore, #tpu.memory_space<semaphore_mem>> -> memref<!tpu.dma_semaphore, #tpu.memory_space<semaphore_mem>>
    tpu.wait_dma2 semaphore(%64 : memref<!tpu.dma_semaphore, #tpu.memory_space<semaphore_mem>>) src(%61 : memref<1x128xf32, #tpu.memory_space<any>>) dst(%62 : memref<1x128xf32, #tpu.memory_space<vmem>>)
    %c5_49 = arith.constant 5 : index
    %65 = memref.load %arg1[%c5_49] : memref<8xi32, #tpu.memory_space<smem>>
    %c5_i32_50 = arith.constant 5 : i32
    %c0_i32_51 = arith.constant 0 : i32
    %66 = tpu.memref_slice %arg2[%65, %c0_i32_51] : memref<256x128xf32, #tpu.memory_space<any>> -> memref<1x128xf32, #tpu.memory_space<any>>
    %c5_i32_52 = arith.constant 5 : i32
    %c0_i32_53 = arith.constant 0 : i32
    %67 = tpu.memref_slice %arg8[%c5_i32_52, %c0_i32_53] : memref<8x128xf32, #tpu.memory_space<vmem>> -> memref<1x128xf32, #tpu.memory_space<vmem>>
    %68 = tpu.memref_slice %arg9[%c5_i32_50] : memref<8x!tpu.dma_semaphore, #tpu.memory_space<semaphore_mem>> -> memref<1x!tpu.dma_semaphore, #tpu.memory_space<semaphore_mem>>
    %69 = tpu.memref_squeeze %68 : memref<1x!tpu.dma_semaphore, #tpu.memory_space<semaphore_mem>> -> memref<!tpu.dma_semaphore, #tpu.memory_space<semaphore_mem>>
    tpu.wait_dma2 semaphore(%69 : memref<!tpu.dma_semaphore, #tpu.memory_space<semaphore_mem>>) src(%66 : memref<1x128xf32, #tpu.memory_space<any>>) dst(%67 : memref<1x128xf32, #tpu.memory_space<vmem>>)
    %c6_54 = arith.constant 6 : index
    %70 = memref.load %arg1[%c6_54] : memref<8xi32, #tpu.memory_space<smem>>
    %c6_i32_55 = arith.constant 6 : i32
    %c0_i32_56 = arith.constant 0 : i32
    %71 = tpu.memref_slice %arg2[%70, %c0_i32_56] : memref<256x128xf32, #tpu.memory_space<any>> -> memref<1x128xf32, #tpu.memory_space<any>>
    %c6_i32_57 = arith.constant 6 : i32
    %c0_i32_58 = arith.constant 0 : i32
    %72 = tpu.memref_slice %arg8[%c6_i32_57, %c0_i32_58] : memref<8x128xf32, #tpu.memory_space<vmem>> -> memref<1x128xf32, #tpu.memory_space<vmem>>
    %73 = tpu.memref_slice %arg9[%c6_i32_55] : memref<8x!tpu.dma_semaphore, #tpu.memory_space<semaphore_mem>> -> memref<1x!tpu.dma_semaphore, #tpu.memory_space<semaphore_mem>>
    %74 = tpu.memref_squeeze %73 : memref<1x!tpu.dma_semaphore, #tpu.memory_space<semaphore_mem>> -> memref<!tpu.dma_semaphore, #tpu.memory_space<semaphore_mem>>
    tpu.wait_dma2 semaphore(%74 : memref<!tpu.dma_semaphore, #tpu.memory_space<semaphore_mem>>) src(%71 : memref<1x128xf32, #tpu.memory_space<any>>) dst(%72 : memref<1x128xf32, #tpu.memory_space<vmem>>)
    %c7_59 = arith.constant 7 : index
    %75 = memref.load %arg1[%c7_59] : memref<8xi32, #tpu.memory_space<smem>>
    %c7_i32_60 = arith.constant 7 : i32
    %c0_i32_61 = arith.constant 0 : i32
    %76 = tpu.memref_slice %arg2[%75, %c0_i32_61] : memref<256x128xf32, #tpu.memory_space<any>> -> memref<1x128xf32, #tpu.memory_space<any>>
    %c7_i32_62 = arith.constant 7 : i32
    %c0_i32_63 = arith.constant 0 : i32
    %77 = tpu.memref_slice %arg8[%c7_i32_62, %c0_i32_63] : memref<8x128xf32, #tpu.memory_space<vmem>> -> memref<1x128xf32, #tpu.memory_space<vmem>>
    %78 = tpu.memref_slice %arg9[%c7_i32_60] : memref<8x!tpu.dma_semaphore, #tpu.memory_space<semaphore_mem>> -> memref<1x!tpu.dma_semaphore, #tpu.memory_space<semaphore_mem>>
    %79 = tpu.memref_squeeze %78 : memref<1x!tpu.dma_semaphore, #tpu.memory_space<semaphore_mem>> -> memref<!tpu.dma_semaphore, #tpu.memory_space<semaphore_mem>>
    tpu.wait_dma2 semaphore(%79 : memref<!tpu.dma_semaphore, #tpu.memory_space<semaphore_mem>>) src(%76 : memref<1x128xf32, #tpu.memory_space<any>>) dst(%77 : memref<1x128xf32, #tpu.memory_space<vmem>>)
    %c0_64 = arith.constant 0 : index
    %c0_65 = arith.constant 0 : index
    %80 = vector.load %arg8[%c0_64, %c0_65] : memref<8x128xf32, #tpu.memory_space<vmem>>, vector<8x128xf32>
    %c0_66 = arith.constant 0 : index
    %c0_67 = arith.constant 0 : index
    %81 = vector.load %arg6[%c0_66, %c0_67] : memref<16x128xf32, #tpu.memory_space<vmem>>, vector<8x128xf32>
    %82 = arith.addf %80, %81 : vector<8x128xf32>
    %83 = arith.truncf %82 : vector<8x128xf32> to vector<8x128xbf16>
    %c0_68 = arith.constant 0 : index
    %c0_69 = arith.constant 0 : index
    %84 = vector.load %arg3[%c0_68, %c0_69] : memref<128x1024xbf16, #tpu.memory_space<vmem>>, vector<128x384xbf16>
    %cst = arith.constant dense<0.000000e+00> : vector<8x384xf32>
    %85 = tpu.matmul %83, %84, %cst {dimension_numbers = #tpu.dot_dimension_numbers<[1], [0], [0], [1], [0, 0, 1, 1], [], []>} : vector<8x128xbf16>, vector<128x384xbf16>, vector<8x384xf32> -> vector<8x384xf32>
    %86 = vector.extract_strided_slice %85 {offsets = [7, 0], sizes = [1, 128], strides = [1, 1]} : vector<8x384xf32> to vector<1x128xf32>
    %87 = vector.extract_strided_slice %85 {offsets = [0, 128], sizes = [8, 128], strides = [1, 1]} : vector<8x384xf32> to vector<8x128xf32>
    %88 = vector.extract_strided_slice %85 {offsets = [0, 256], sizes = [8, 128], strides = [1, 1]} : vector<8x384xf32> to vector<8x128xf32>
    %89 = arith.truncf %86 : vector<1x128xf32> to vector<1x128xbf16>
    %90 = arith.truncf %87 : vector<8x128xf32> to vector<8x128xbf16>
    %cst_70 = arith.constant dense<0.000000e+00> : vector<1x8xf32>
    %91 = tpu.matmul %89, %90, %cst_70 {dimension_numbers = #tpu.dot_dimension_numbers<[1], [1], [0], [0], [0, 0, 1, 0], [], []>} : vector<1x128xbf16>, vector<8x128xbf16>, vector<1x8xf32> -> vector<1x8xf32>
    %cst_71 = arith.constant dense<0xFF800000> : vector<1xf32>
    %92 = vector.multi_reduction <maximumf>, %91, %cst_71 [1] : vector<1x8xf32> to vector<1xf32>
    %93 = vector.shape_cast %92 : vector<1xf32> to vector<1x1xf32>
    %94 = vector.broadcast %93 : vector<1x1xf32> to vector<1x8xf32>
    %95 = arith.subf %91, %94 : vector<1x8xf32>
    %96 = math.exp %95 : vector<1x8xf32>
    %cst_72 = arith.constant dense<0.000000e+00> : vector<1xf32>
    %97 = vector.multi_reduction <add>, %96, %cst_72 [1] : vector<1x8xf32> to vector<1xf32>
    %98 = vector.shape_cast %97 : vector<1xf32> to vector<1x1xf32>
    %99 = tpu.reciprocal %98 {approx = true} : vector<1x1xf32> -> vector<1x1xf32>
    %100 = vector.broadcast %99 : vector<1x1xf32> to vector<1x8xf32>
    %101 = arith.mulf %96, %100 : vector<1x8xf32>
    %102 = arith.truncf %101 : vector<1x8xf32> to vector<1x8xbf16>
    %103 = arith.truncf %88 : vector<8x128xf32> to vector<8x128xbf16>
    %cst_73 = arith.constant dense<0.000000e+00> : vector<1x128xf32>
    %104 = tpu.matmul %102, %103, %cst_73 {dimension_numbers = #tpu.dot_dimension_numbers<[1], [0], [0], [1], [0, 0, 1, 1], [], []>} : vector<1x8xbf16>, vector<8x128xbf16>, vector<1x128xf32> -> vector<1x128xf32>
    %105 = arith.truncf %104 : vector<1x128xf32> to vector<1x128xbf16>
    %c0_74 = arith.constant 0 : index
    %c384 = arith.constant 384 : index
    %106 = vector.load %arg3[%c0_74, %c384] : memref<128x1024xbf16, #tpu.memory_space<vmem>>, vector<128x128xbf16>
    %cst_75 = arith.constant dense<0.000000e+00> : vector<1x128xf32>
    %107 = tpu.matmul %105, %106, %cst_75 {dimension_numbers = #tpu.dot_dimension_numbers<[1], [0], [0], [1], [0, 0, 1, 1], [], []>} : vector<1x128xbf16>, vector<128x128xbf16>, vector<1x128xf32> -> vector<1x128xf32>
    %c8 = arith.constant 8 : index
    %c0_76 = arith.constant 0 : index
    %108 = vector.load %arg6[%c8, %c0_76] : memref<16x128xf32, #tpu.memory_space<vmem>>, vector<1x128xf32>
    %c9 = arith.constant 9 : index
    %c0_77 = arith.constant 0 : index
    %109 = vector.load %arg6[%c9, %c0_77] : memref<16x128xf32, #tpu.memory_space<vmem>>, vector<1x128xf32>
    %c10 = arith.constant 10 : index
    %c0_78 = arith.constant 0 : index
    %110 = vector.load %arg6[%c10, %c0_78] : memref<16x128xf32, #tpu.memory_space<vmem>>, vector<1x128xf32>
    %c11 = arith.constant 11 : index
    %c0_79 = arith.constant 0 : index
    %111 = vector.load %arg6[%c11, %c0_79] : memref<16x128xf32, #tpu.memory_space<vmem>>, vector<1x128xf32>
    %c12 = arith.constant 12 : index
    %c0_80 = arith.constant 0 : index
    %112 = vector.load %arg6[%c12, %c0_80] : memref<16x128xf32, #tpu.memory_space<vmem>>, vector<1x128xf32>
    %113 = vector.extract_strided_slice %82 {offsets = [7, 0], sizes = [1, 128], strides = [1, 1]} : vector<8x128xf32> to vector<1x128xf32>
    %114 = arith.addf %113, %107 : vector<1x128xf32>
    %cst_81 = arith.constant dense<0.000000e+00> : vector<1xf32>
    %115 = vector.multi_reduction <add>, %114, %cst_81 [1] : vector<1x128xf32> to vector<1xf32>
    %116 = vector.shape_cast %115 : vector<1xf32> to vector<1x1xf32>
    %cst_82 = arith.constant 1.280000e+02 : f32
    %117 = vector.broadcast %cst_82 : f32 to vector<1x1xf32>
    %118 = arith.divf %116, %117 : vector<1x1xf32>
    %119 = vector.broadcast %118 : vector<1x1xf32> to vector<1x128xf32>
    %120 = arith.subf %114, %119 : vector<1x128xf32>
    %121 = arith.mulf %120, %120 : vector<1x128xf32>
    %cst_83 = arith.constant dense<0.000000e+00> : vector<1xf32>
    %122 = vector.multi_reduction <add>, %121, %cst_83 [1] : vector<1x128xf32> to vector<1xf32>
    %123 = vector.shape_cast %122 : vector<1xf32> to vector<1x1xf32>
    %cst_84 = arith.constant 1.280000e+02 : f32
    %124 = vector.broadcast %cst_84 : f32 to vector<1x1xf32>
    %125 = arith.divf %123, %124 : vector<1x1xf32>
    %126 = vector.broadcast %118 : vector<1x1xf32> to vector<1x128xf32>
    %127 = arith.subf %114, %126 : vector<1x128xf32>
    %cst_85 = arith.constant 9.99999974E-6 : f32
    %128 = vector.broadcast %cst_85 : f32 to vector<1x1xf32>
    %129 = arith.addf %125, %128 : vector<1x1xf32>
    %130 = math.rsqrt %129 : vector<1x1xf32>
    %131 = vector.broadcast %130 : vector<1x1xf32> to vector<1x128xf32>
    %132 = arith.mulf %127, %131 : vector<1x128xf32>
    %133 = arith.mulf %132, %108 : vector<1x128xf32>
    %134 = arith.addf %133, %109 : vector<1x128xf32>
    %135 = arith.truncf %134 : vector<1x128xf32> to vector<1x128xbf16>
    %c0_86 = arith.constant 0 : index
    %c512 = arith.constant 512 : index
    %136 = vector.load %arg3[%c0_86, %c512] : memref<128x1024xbf16, #tpu.memory_space<vmem>>, vector<128x512xbf16>
    %cst_87 = arith.constant dense<0.000000e+00> : vector<1x512xf32>
    %137 = tpu.matmul %135, %136, %cst_87 {dimension_numbers = #tpu.dot_dimension_numbers<[1], [0], [0], [1], [0, 0, 1, 1], [], []>} : vector<1x128xbf16>, vector<128x512xbf16>, vector<1x512xf32> -> vector<1x512xf32>
    %c0_88 = arith.constant 0 : index
    %c0_89 = arith.constant 0 : index
    %138 = vector.load %arg5[%c0_88, %c0_89] : memref<1x512xf32, #tpu.memory_space<vmem>>, vector<1x512xf32>
    %139 = arith.addf %137, %138 : vector<1x512xf32>
    %140 = arith.mulf %139, %139 : vector<1x512xf32>
    %141 = arith.mulf %139, %140 : vector<1x512xf32>
    %cst_90 = arith.constant 4.471500e-02 : f32
    %142 = vector.broadcast %cst_90 : f32 to vector<1x512xf32>
    %143 = arith.mulf %142, %141 : vector<1x512xf32>
    %144 = arith.addf %139, %143 : vector<1x512xf32>
    %cst_91 = arith.constant 0.797884583 : f32
    %145 = vector.broadcast %cst_91 : f32 to vector<1x512xf32>
    %146 = arith.mulf %145, %144 : vector<1x512xf32>
    %147 = math.tanh %146 : vector<1x512xf32>
    %cst_92 = arith.constant 1.000000e+00 : f32
    %148 = vector.broadcast %cst_92 : f32 to vector<1x512xf32>
    %149 = arith.addf %148, %147 : vector<1x512xf32>
    %cst_93 = arith.constant 5.000000e-01 : f32
    %150 = vector.broadcast %cst_93 : f32 to vector<1x512xf32>
    %151 = arith.mulf %150, %149 : vector<1x512xf32>
    %152 = arith.mulf %139, %151 : vector<1x512xf32>
    %153 = arith.truncf %152 : vector<1x512xf32> to vector<1x512xbf16>
    %c0_94 = arith.constant 0 : index
    %c0_95 = arith.constant 0 : index
    %154 = vector.load %arg4[%c0_94, %c0_95] : memref<512x128xbf16, #tpu.memory_space<vmem>>, vector<512x128xbf16>
    %cst_96 = arith.constant dense<0.000000e+00> : vector<1x128xf32>
    %155 = tpu.matmul %153, %154, %cst_96 {dimension_numbers = #tpu.dot_dimension_numbers<[1], [0], [0], [1], [0, 0, 1, 1], [], []>} : vector<1x512xbf16>, vector<512x128xbf16>, vector<1x128xf32> -> vector<1x128xf32>
    %156 = arith.addf %155, %112 : vector<1x128xf32>
    %157 = arith.addf %134, %156 : vector<1x128xf32>
    %cst_97 = arith.constant dense<0.000000e+00> : vector<1xf32>
    %158 = vector.multi_reduction <add>, %157, %cst_97 [1] : vector<1x128xf32> to vector<1xf32>
    %159 = vector.shape_cast %158 : vector<1xf32> to vector<1x1xf32>
    %cst_98 = arith.constant 1.280000e+02 : f32
    %160 = vector.broadcast %cst_98 : f32 to vector<1x1xf32>
    %161 = arith.divf %159, %160 : vector<1x1xf32>
    %162 = vector.broadcast %161 : vector<1x1xf32> to vector<1x128xf32>
    %163 = arith.subf %157, %162 : vector<1x128xf32>
    %164 = arith.mulf %163, %163 : vector<1x128xf32>
    %cst_99 = arith.constant dense<0.000000e+00> : vector<1xf32>
    %165 = vector.multi_reduction <add>, %164, %cst_99 [1] : vector<1x128xf32> to vector<1xf32>
    %166 = vector.shape_cast %165 : vector<1xf32> to vector<1x1xf32>
    %cst_100 = arith.constant 1.280000e+02 : f32
    %167 = vector.broadcast %cst_100 : f32 to vector<1x1xf32>
    %168 = arith.divf %166, %167 : vector<1x1xf32>
    %169 = vector.broadcast %161 : vector<1x1xf32> to vector<1x128xf32>
    %170 = arith.subf %157, %169 : vector<1x128xf32>
    %cst_101 = arith.constant 9.99999974E-6 : f32
    %171 = vector.broadcast %cst_101 : f32 to vector<1x1xf32>
    %172 = arith.addf %168, %171 : vector<1x1xf32>
    %173 = math.rsqrt %172 : vector<1x1xf32>
    %174 = vector.broadcast %173 : vector<1x1xf32> to vector<1x128xf32>
    %175 = arith.mulf %170, %174 : vector<1x128xf32>
    %176 = arith.mulf %175, %110 : vector<1x128xf32>
    %177 = arith.addf %176, %111 : vector<1x128xf32>
    %c0_102 = arith.constant 0 : index
    %c0_103 = arith.constant 0 : index
    %178 = vector.load %arg7[%c0_102, %c0_103] : memref<1x128xf32, #tpu.memory_space<vmem>>, vector<1x128xf32>
    tpu.vector_store %arg7[%c0_102, %c0_103], %177 {strides = array<i32>} : memref<1x128xf32, #tpu.memory_space<vmem>>, vector<1x128xf32>,
    return
  }
  func.func @transform_1(%arg0: i32, %arg1: memref<8xi32, #tpu.memory_space<smem>>) -> (i32, i32) {
    %c0_i32 = arith.constant 0 : i32
    %c0_i32_0 = arith.constant 0 : i32
    %c0_i32_1 = arith.constant 0 : i32
    return %c0_i32, %c0_i32_0 : i32, i32
  }
  func.func @transform_2(%arg0: i32, %arg1: memref<8xi32, #tpu.memory_space<smem>>) -> (i32, i32) {
    %c0_i32 = arith.constant 0 : i32
    %c0_i32_0 = arith.constant 0 : i32
    %c0_i32_1 = arith.constant 0 : i32
    return %c0_i32, %c0_i32_0 : i32, i32
  }
  func.func @transform_3(%arg0: i32, %arg1: memref<8xi32, #tpu.memory_space<smem>>) -> (i32, i32) {
    %c0_i32 = arith.constant 0 : i32
    %c0_i32_0 = arith.constant 0 : i32
    %c0_i32_1 = arith.constant 0 : i32
    return %c0_i32, %c0_i32_0 : i32, i32
  }
  func.func @transform_4(%arg0: i32, %arg1: memref<8xi32, #tpu.memory_space<smem>>) -> (i32, i32) {
    %c0_i32 = arith.constant 0 : i32
    %c0_i32_0 = arith.constant 0 : i32
    %c0_i32_1 = arith.constant 0 : i32
    return %c0_i32, %c0_i32_0 : i32, i32
  }
  func.func @transform_5(%arg0: i32, %arg1: memref<8xi32, #tpu.memory_space<smem>>) -> (i32, i32) {
    %c0_i32 = arith.constant 0 : i32
    %c0_i32_0 = arith.constant 0 : i32
    %c0_i32_1 = arith.constant 0 : i32
    return %c0_i32, %c0_i32_0 : i32, i32
  }
}

</mosaic_0001>

<bundles_post_ra>
// kernel: base_model_last_token.1
= control target key start
LH: loop header
LB: loop body
LE: loop exit
PB: predicated region body
PF: predicated region fallthrough
CT: control target
= control target key end

     0   :  { %s2095_s21 = smov [#allocation5]   ;;  %s2349_s0 = inlined_call_operand.hbm [shape: s32[8], index: 0, kind: input, shape index: {}]   ;;  %s2350_s1 = inlined_call_operand.hbm [shape: f32[256,128], index: 1, kind: input, shape index: {}]   ;;  %s2351_s2 = inlined_call_operand.hbm [shape: bf16[128,1024], index: 2, kind: input, shape index: {}]   ;;  %s2352_s3 = inlined_call_operand.hbm [shape: bf16[512,128], index: 3, kind: input, shape index: {}]   ;;  %s2353_s4 = inlined_call_operand.vmem [shape: f32[1,512], index: 4, kind: input, shape index: {}]   ;;  %s2354_s5 = inlined_call_operand.hbm [shape: f32[16,128], index: 5, kind: input, shape index: {}]   ;;  %s2355_s6 = inlined_call_operand.hbm [shape: f32[1,128], index: 6, kind: output, shape index: {}]  }
   0x1   :  { %12 = dma.hbm_to_smem %s2349_s0, 16, %s2095_s21, [#allocation4] }
   0x2   :  { %2071 = dma.done.wait [#allocation4], 16 }
   0x3   :  { %2072 = vsyncadd [#allocation4], 4294967280 }
   0x4   :  { %14 = sfence }
   0x5   :  { %15 = vsyncpa [#allocation7], 0 }
   0x6   :  { %16 = vsyncpa [#allocation10], 0 }
   0x7   :  { %17 = vsyncpa [#allocation8], 0  ;;  %s2096_s24 = smov [#allocation9]  }
   0x8   :  { %s35_s25 = sshll.u32 %s2096_s24, 4  ;;  %s36_s25 = int_to_ptr.vmem [resolvable:$true] %s35_s25 }
   0x9   :  { %s1823_s26 = scalar_lea.vmem %s36_s25, 4096  ;;  %p1828_p1 = scmp.lt.s32.totalorder %s36_s25, %s36_s25 }
   0xa   :  { %p1824_p0 = scmp.ne.s32.totalorder %s36_s25, %s1823_s26  ;;  %p1829_p2 = scmp.lt.s32.totalorder %s1823_s26, %s1823_s26 }
   0xc   :  { %p1830_p3 = por %p1829_p2, %p1828_p1 }
   0xe   :  { %p1831_p4 = pnand %p1830_p3, %p1824_p0 }
  0x10   :  { %1834 = shalt.err (!%p1831_p4)
}
  0x11   :  { %s2097_s27 = smov 64   ;;  %s2098_s28 = smov 4  }
  0x12   :  { %41 = dma.hbm_to_vmem [thread:$0]  %s2352_s3, 4096, %s36_s25, [#allocation10], %s2097_s27, %s2097_s27, %s2098_s28  }
  0x13   :  { %s2099_s30 = smov [#allocation6]  }
  0x14   :  { %s23_s7 = sshll.u32 %s2099_s30, 4  ;;  %s24_s7 = int_to_ptr.vmem [resolvable:$true] %s23_s7 }
  0x15   :  { %s1843_s8 = scalar_lea.vmem %s24_s7, 8192  ;;  %p1848_p6 = scmp.lt.s32.totalorder %s24_s7, %s24_s7 }
  0x16   :  { %p1844_p5 = scmp.ne.s32.totalorder %s24_s7, %s1843_s8  ;;  %p1849_p7 = scmp.lt.s32.totalorder %s1843_s8, %s1843_s8 }
  0x18   :  { %p1850_p8 = por %p1849_p7, %p1848_p6 }
  0x1a   :  { %p1851_p9 = pnand %p1850_p8, %p1844_p5 }
  0x1c   :  { %1854 = shalt.err (!%p1851_p9)
}
  0x1d   :  { %s2100_s9 = smov 512   ;;  %s2101_s10 = smov 32  }
  0x1e   :  { %29 = dma.hbm_to_vmem [thread:$0]  %s2351_s2, 8192, %s24_s7, [#allocation7], %s2100_s9, %s2100_s9, %s2101_s10  }
  0x1f   :  { %s2102_s13 = smov [#allocation11]  }
  0x20   :  { %s49_s14 = sshll.u32 %s2102_s13, 4  ;;  %s50_s14 = int_to_ptr.vmem [resolvable:$true] %s49_s14 }
  0x21   :  { %s1863_s3 = scalar_lea.vmem %s50_s14, 256  ;;  %p1868_p11 = scmp.lt.s32.totalorder %s50_s14, %s50_s14 }
  0x22   :  { %p1864_p10 = scmp.ne.s32.totalorder %s50_s14, %s1863_s3  ;;  %p1869_p12 = scmp.lt.s32.totalorder %s1863_s3, %s1863_s3 }
  0x24   :  { %p1870_p13 = por %p1869_p12, %p1868_p11 }
  0x26   :  { %p1871_p0 = pnand %p1870_p13, %p1864_p10 }
  0x28   :  { %1874 = shalt.err (!%p1871_p0)
}
  0x29   :  { %s2103_s15 = smov 128   ;;  %s2104_s16 = smov 8  }
  0x2a   :  { %55 = dma.hbm_to_vmem [thread:$0]  %s2354_s5, 256, %s50_s14, [#allocation10], %s2103_s15, %s2103_s15, %s2104_s16  }
  0x2b   :  { %2073 = dma.done.wait [#allocation7], 8192  }
  0x2c   :  { %2074 = vsyncadd [#allocation7], 4294959104 }
  0x2d   :  { %2075 = dma.done.wait [#allocation10], 4352  }
  0x2e   :  { %2076 = vsyncadd [#allocation10], 4294962944  ;;  %s66_s2 = sld [smem:[#allocation5]]  ;;  %s2105_s19 = smov [#allocation2]  }
  0x2f   :  { %s76_s20 = sshll.u32 %s2105_s19, 4  ;;  %s2166_s21 = sld [smem:[#allocation5 + $0x1]]  ;;  %s2164_s20 = int_to_ptr.vmem [resolvable:$true] %s76_s20 }
  0x30   :  { %s2106_s22 = smov [#allocation2 + $0x1]   ;;  %s2168_s24 = sld [smem:[#allocation5 + $0x2]] }
  0x31   :  { %s92_s23 = sshll.u32 %s2106_s22, 4  ;;  %s2107_s25 = smov [#allocation2 + $0x2]   ;;  %s2170_s23 = int_to_ptr.vmem [resolvable:$true] %s92_s23 }
  0x32   :  { %s108_s5 = sshll.u32 %s2107_s25, 4  ;;  %s2172_s26 = sld [smem:[#allocation5 + $0x3]]  ;;  %s2174_s5 = int_to_ptr.vmem [resolvable:$true] %s108_s5 }
  0x33   :  { %s2108_s28 = smov [#allocation2 + $0x3]   ;;  %s2185_s12 = scalar_lea.hbm %s2350_s1, 4096 }
  0x34   :  { %s1499_s27 = sshll.u32 %s66_s2, 4  ;;  %s2176_s29 = sshll.u32 %s2108_s28, 4  ;;  %s125_s29 = int_to_ptr.vmem [resolvable:$true] %s2176_s29 }
  0x35   :  { %s68_s7 = scalar_lea.hbm %s2350_s1, %s1499_s27  ;;  %s1501_s8 = sshll.u32 %s2166_s21, 4 }
  0x36   :  { %s1875_s9 = scalar_lea.hbm %s68_s7, 16  ;;  %p1878_p2 = scmp.lt.s32.totalorder %s68_s7, %s2350_s1 }
  0x37   :  { %p1876_p1 = scmp.ne.s32.totalorder %s68_s7, %s1875_s9  ;;  %p1879_p3 = scmp.lt.s32.totalorder %s2185_s12, %s1875_s9 }
  0x39   :  { %p1880_p4 = por %p1879_p3, %p1878_p2 }
  0x3b   :  { %p1881_p5 = pnand %p1880_p4, %p1876_p1 }
  0x3d   :  { %1884 = shalt.err (!%p1881_p5)  }
  0x3e   :  { %s1885_s3 = scalar_lea.vmem %s2164_s20, 16  ;;  %s2194_s15 = scalar_lea.vmem %s2164_s20, 128 }
  0x3f   :  { %p1886_p6 = scmp.ne.s32.totalorder %s2164_s20, %s1885_s3  ;;  %p1890_p7 = scmp.lt.s32.totalorder %s2164_s20, %s2164_s20 }
  0x40   :  { %p1891_p8 = scmp.lt.s32.totalorder %s2194_s15, %s1885_s3 }
  0x42   :  { %p1892_p9 = por %p1891_p8, %p1890_p7 }
  0x44   :  { %p1893_p10 = pnand %p1892_p9, %p1886_p6 }
  0x46   :  { %1896 = shalt.err (!%p1893_p10)  }
  0x47   :  { %79 = dma.hbm_to_vmem [thread:$0]  %s68_s7, 16, %s2164_s20, [#allocation3] }
  0x48   :  { %s82_s18 = scalar_lea.hbm %s2350_s1, %s1501_s8  ;;  %s1503_s2 = sshll.u32 %s2168_s24, 4 }
  0x49   :  { %s1897_s19 = scalar_lea.hbm %s82_s18, 16  ;;  %p1900_p12 = scmp.lt.s32.totalorder %s82_s18, %s2350_s1 }
  0x4a   :  { %p1898_p11 = scmp.ne.s32.totalorder %s82_s18, %s1897_s19  ;;  %p1901_p13 = scmp.lt.s32.totalorder %s2185_s12, %s1897_s19 }
  0x4c   :  { %p1902_p0 = por %p1901_p13, %p1900_p12 }
  0x4e   :  { %p1903_p1 = pnand %p1902_p0, %p1898_p11 }
  0x50   :  { %1906 = shalt.err (!%p1903_p1)  }
  0x51   :  { %s1907_s25 = scalar_lea.vmem %s2170_s23, 16  ;;  %p1912_p3 = scmp.lt.s32.totalorder %s2170_s23, %s2164_s20 }
  0x52   :  { %p1908_p2 = scmp.ne.s32.totalorder %s2170_s23, %s1907_s25  ;;  %p1913_p4 = scmp.lt.s32.totalorder %s2194_s15, %s1907_s25 }
  0x54   :  { %p1914_p5 = por %p1913_p4, %p1912_p3 }
  0x56   :  { %p1915_p6 = pnand %p1914_p5, %p1908_p2 }
  0x58   :  { %1918 = shalt.err (!%p1915_p6)  }
  0x59   :  { %95 = dma.hbm_to_vmem [thread:$0]  %s82_s18, 16, %s2170_s23, [#allocation3 + $0x1] }
  0x5a   :  { %s98_s28 = scalar_lea.hbm %s2350_s1, %s1503_s2  ;;  %s1505_s0 = sshll.u32 %s2172_s26, 4 }
  0x5b   :  { %s1919_s30 = scalar_lea.hbm %s98_s28, 16  ;;  %p1922_p8 = scmp.lt.s32.totalorder %s98_s28, %s2350_s1 }
  0x5c   :  { %p1920_p7 = scmp.ne.s32.totalorder %s98_s28, %s1919_s30  ;;  %p1923_p9 = scmp.lt.s32.totalorder %s2185_s12, %s1919_s30 }
  0x5e   :  { %p1924_p10 = por %p1923_p9, %p1922_p8 }
  0x60   :  { %p1925_p11 = pnand %p1924_p10, %p1920_p7 }
  0x62   :  { %1928 = shalt.err (!%p1925_p11)  }
  0x63   :  { %s1929_s23 = scalar_lea.vmem %s2174_s5, 16  ;;  %p1934_p13 = scmp.lt.s32.totalorder %s2174_s5, %s2164_s20 }
  0x64   :  { %p1930_p12 = scmp.ne.s32.totalorder %s2174_s5, %s1929_s23  ;;  %p1935_p0 = scmp.lt.s32.totalorder %s2194_s15, %s1929_s23 }
  0x66   :  { %p1936_p1 = por %p1935_p0, %p1934_p13 }
  0x68   :  { %p1937_p2 = pnand %p1936_p1, %p1930_p12 }
  0x6a   :  { %1940 = shalt.err (!%p1937_p2)  }
  0x6b   :  { %111 = dma.hbm_to_vmem [thread:$0]  %s98_s28, 16, %s2174_s5, [#allocation3 + $0x2] }
  0x6c   :  { %s114_s10 = scalar_lea.hbm %s2350_s1, %s1505_s0 }
  0x6d   :  { %s1941_s11 = scalar_lea.hbm %s114_s10, 16  ;;  %p1944_p4 = scmp.lt.s32.totalorder %s114_s10, %s2350_s1 }
  0x6e   :  { %p1942_p3 = scmp.ne.s32.totalorder %s114_s10, %s1941_s11  ;;  %p1945_p5 = scmp.lt.s32.totalorder %s2185_s12, %s1941_s11 }
  0x70   :  { %p1946_p6 = por %p1945_p5, %p1944_p4 }
  0x72   :  { %p1947_p7 = pnand %p1946_p6, %p1942_p3 }
  0x74   :  { %1950 = shalt.err (!%p1947_p7)  }
  0x75   :  { %s1951_s3 = scalar_lea.vmem %s125_s29, 16  ;;  %p1956_p9 = scmp.lt.s32.totalorder %s125_s29, %s2164_s20 }
  0x76   :  { %p1952_p8 = scmp.ne.s32.totalorder %s125_s29, %s1951_s3  ;;  %p1957_p10 = scmp.lt.s32.totalorder %s2194_s15, %s1951_s3 }
  0x78   :  { %p1958_p11 = por %p1957_p10, %p1956_p9 }
  0x7a   :  { %p1959_p12 = pnand %p1958_p11, %p1952_p8 }
  0x7c   :  { %1962 = shalt.err (!%p1959_p12)  }
  0x7d   :  { %127 = dma.hbm_to_vmem [thread:$0]  %s114_s10, 16, %s125_s29, [#allocation3 + $0x3] }
  0x7e   :  { %s1506_s5 = sld [smem:[#allocation5 + $0x4]]  ;;  %s2109_s16 = smov [#allocation2 + $0x4]  }
  0x7f   :  { %s140_s17 = sshll.u32 %s2109_s16, 4  ;;  %s2238_s18 = sld [smem:[#allocation5 + $0x5]]  ;;  %s141_s17 = int_to_ptr.vmem [resolvable:$true] %s140_s17 }
  0x80   :  { %s2110_s2 = smov [#allocation2 + $0x5]   ;;  %s2240_s21 = sld [smem:[#allocation5 + $0x6]] }
  0x81   :  { %s156_s19 = sshll.u32 %s2110_s2, 4  ;;  %s2111_s22 = smov [#allocation2 + $0x6]   ;;  %s2242_s19 = int_to_ptr.vmem [resolvable:$true] %s156_s19 }
  0x82   :  { %s172_s25 = sshll.u32 %s2111_s22, 4  ;;  %s2244_s24 = sld [smem:[#allocation5 + $0x7]]  ;;  %s2246_s25 = int_to_ptr.vmem [resolvable:$true] %s172_s25 }
  0x84   :  { %s1507_s27 = sshll.u32 %s1506_s5, 4 }
  0x85   :  { %s130_s0 = scalar_lea.hbm %s2350_s1, %s1507_s27  ;;  %s1509_s30 = sshll.u32 %s2238_s18, 4 }
  0x86   :  { %s1963_s7 = scalar_lea.hbm %s130_s0, 16  ;;  %p1966_p0 = scmp.lt.s32.totalorder %s130_s0, %s2350_s1 }
  0x87   :  { %p1964_p13 = scmp.ne.s32.totalorder %s130_s0, %s1963_s7  ;;  %p1967_p1 = scmp.lt.s32.totalorder %s2185_s12, %s1963_s7 }
  0x89   :  { %p1968_p2 = por %p1967_p1, %p1966_p0 }
  0x8b   :  { %p1969_p3 = pnand %p1968_p2, %p1964_p13 }
  0x8d   :  { %1972 = shalt.err (!%p1969_p3)  }
  0x8e   :  { %s1973_s26 = scalar_lea.vmem %s141_s17, 16  ;;  %p1978_p5 = scmp.lt.s32.totalorder %s141_s17, %s2164_s20 }
  0x8f   :  { %p1974_p4 = scmp.ne.s32.totalorder %s141_s17, %s1973_s26  ;;  %p1979_p6 = scmp.lt.s32.totalorder %s2194_s15, %s1973_s26 }
  0x91   :  { %p1980_p7 = por %p1979_p6, %p1978_p5 }
  0x93   :  { %p1981_p8 = pnand %p1980_p7, %p1974_p4 }
  0x95   :  { %1984 = shalt.err (!%p1981_p8)  }
  0x96   :  { %143 = dma.hbm_to_vmem [thread:$0]  %s130_s0, 16, %s141_s17, [#allocation3 + $0x4] }
  0x97   :  { %s146_s11 = scalar_lea.hbm %s2350_s1, %s1509_s30  ;;  %s1511_s13 = sshll.u32 %s2240_s21, 4 }
  0x98   :  { %s1985_s14 = scalar_lea.hbm %s146_s11, 16  ;;  %p1988_p10 = scmp.lt.s32.totalorder %s146_s11, %s2350_s1 }
  0x99   :  { %p1986_p9 = scmp.ne.s32.totalorder %s146_s11, %s1985_s14  ;;  %p1989_p11 = scmp.lt.s32.totalorder %s2185_s12, %s1985_s14 }
  0x9b   :  { %p1990_p12 = por %p1989_p11, %p1988_p10 }
  0x9d   :  { %p1991_p13 = pnand %p1990_p12, %p1986_p9 }
  0x9f   :  { %1994 = shalt.err (!%p1991_p13)  }
  0xa0   :  { %s1995_s16 = scalar_lea.vmem %s2242_s19, 16  ;;  %p2000_p1 = scmp.lt.s32.totalorder %s2242_s19, %s2164_s20 }
  0xa1   :  { %p1996_p0 = scmp.ne.s32.totalorder %s2242_s19, %s1995_s16  ;;  %p2001_p2 = scmp.lt.s32.totalorder %s2194_s15, %s1995_s16 }
  0xa3   :  { %p2002_p3 = por %p2001_p2, %p2000_p1 }
  0xa5   :  { %p2003_p4 = pnand %p2002_p3, %p1996_p0 }
  0xa7   :  { %2006 = shalt.err (!%p2003_p4)  }
  0xa8   :  { %159 = dma.hbm_to_vmem [thread:$0]  %s146_s11, 16, %s2242_s19, [#allocation3 + $0x5] }
  0xa9   :  { %s162_s2 = scalar_lea.hbm %s2350_s1, %s1511_s13  ;;  %s1513_s21 = sshll.u32 %s2244_s24, 4 }
  0xaa   :  { %s2007_s22 = scalar_lea.hbm %s162_s2, 16  ;;  %p2010_p6 = scmp.lt.s32.totalorder %s162_s2, %s2350_s1 }
  0xab   :  { %p2008_p5 = scmp.ne.s32.totalorder %s162_s2, %s2007_s22  ;;  %p2011_p7 = scmp.lt.s32.totalorder %s2185_s12, %s2007_s22 }
  0xad   :  { %p2012_p8 = por %p2011_p7, %p2010_p6 }
  0xaf   :  { %p2013_p9 = pnand %p2012_p8, %p2008_p5 }
  0xb1   :  { %2016 = shalt.err (!%p2013_p9)  }
  0xb2   :  { %s2017_s19 = scalar_lea.vmem %s2246_s25, 16  ;;  %p2022_p11 = scmp.lt.s32.totalorder %s2246_s25, %s2164_s20 }
  0xb3   :  { %p2018_p10 = scmp.ne.s32.totalorder %s2246_s25, %s2017_s19  ;;  %p2023_p12 = scmp.lt.s32.totalorder %s2194_s15, %s2017_s19 }
  0xb5   :  { %p2024_p13 = por %p2023_p12, %p2022_p11 }
  0xb7   :  { %p2025_p0 = pnand %p2024_p13, %p2018_p10 }
  0xb9   :  { %2028 = shalt.err (!%p2025_p0)  }
  0xba   :  { %175 = dma.hbm_to_vmem [thread:$0]  %s162_s2, 16, %s2246_s25, [#allocation3 + $0x6] }
  0xbb   :  { %s178_s0 = scalar_lea.hbm %s2350_s1, %s1513_s21  ;;  %s2112_s30 = smov [#allocation2 + $0x7]  }
  0xbc   :  { %s188_s7 = sshll.u32 %s2112_s30, 4  ;;  %s2029_s8 = scalar_lea.hbm %s178_s0, 16  ;;  %s189_s7 = int_to_ptr.vmem [resolvable:$true] %s188_s7 }
  0xbd   :  { %p2030_p1 = scmp.ne.s32.totalorder %s178_s0, %s2029_s8  ;;  %p2032_p2 = scmp.lt.s32.totalorder %s178_s0, %s2350_s1 }
  0xbe   :  { %p2033_p3 = scmp.lt.s32.totalorder %s2185_s12, %s2029_s8 }
  0xc0   :  { %p2034_p4 = por %p2033_p3, %p2032_p2 }
  0xc2   :  { %p2035_p5 = pnand %p2034_p4, %p2030_p1 }
  0xc4   :  { %2038 = shalt.err (!%p2035_p5)  }
  0xc5   :  { %s2039_s9 = scalar_lea.vmem %s189_s7, 16  ;;  %p2044_p7 = scmp.lt.s32.totalorder %s189_s7, %s2164_s20 }
  0xc6   :  { %p2040_p6 = scmp.ne.s32.totalorder %s189_s7, %s2039_s9  ;;  %p2045_p8 = scmp.lt.s32.totalorder %s2194_s15, %s2039_s9 }
  0xc8   :  { %p2046_p9 = por %p2045_p8, %p2044_p7 }
  0xca   :  { %p2047_p10 = pnand %p2046_p9, %p2040_p6 }
  0xcc   :  { %2050 = shalt.err (!%p2047_p10)  }
  0xcd   :  { %191 = dma.hbm_to_vmem [thread:$0]  %s178_s0, 16, %s189_s7, [#allocation3 + $0x7] }
  0xce   :  { %2077 = dma.done.wait [#allocation3], 16 }
  0xcf   :  { %2078 = vsyncadd [#allocation3], 4294967280 }
  0xd0   :  { %2079 = dma.done.wait [#allocation3 + $0x1], 16 }
  0xd1   :  { %2080 = vsyncadd [#allocation3 + $0x1], 4294967280 }
  0xd2   :  { %2081 = dma.done.wait [#allocation3 + $0x2], 16 }
  0xd3   :  { %2082 = vsyncadd [#allocation3 + $0x2], 4294967280 }
  0xd4   :  { %2083 = dma.done.wait [#allocation3 + $0x3], 16 }
  0xd5   :  { %2084 = vsyncadd [#allocation3 + $0x3], 4294967280 }
  0xd6   :  { %2085 = dma.done.wait [#allocation3 + $0x4], 16 }
  0xd7   :  { %2086 = vsyncadd [#allocation3 + $0x4], 4294967280 }
  0xd8   :  { %2087 = dma.done.wait [#allocation3 + $0x5], 16 }
  0xd9   :  { %2088 = vsyncadd [#allocation3 + $0x5], 4294967280 }
  0xda   :  { %2089 = dma.done.wait [#allocation3 + $0x6], 16 }
  0xdb   :  { %2090 = vsyncadd [#allocation3 + $0x6], 4294967280 }
  0xdc   :  { %2091 = dma.done.wait [#allocation3 + $0x7], 16 }
  0xdd   :  { %2092 = vsyncadd [#allocation3 + $0x7], 4294967280  ;;  %v2113_v0 = vmov 0   ;;  %v2114_v1 = vmov 0.0   ;;  %vm2115_vm0 = vmmov 0   ;;  %v249_v2 = vld [vmem:[#allocation6 + $0x1c0] sm:$0xff] }
  0xde   :  { %413 = vmatprep.mubr.bf16.mxu0 %v2113_v0  ;;  %1685 = vmatprep.subr.bf16.mxu1 %v2114_v1  ;;  %v251_v3 = vld [vmem:[#allocation6 + $0x1e0] sm:$0xff]  ;;  %v250_v15 = vld [vmem:[#allocation6 + $0x1c8] sm:$0xf]  ;;  %v217_v48 = vld [vmem:[#allocation2] sm:$0xff]  ;;  %vm527_vm1 = vcmask 1043456   ;;  %vm509_vm2 = vcmask 57344  }
  0xdf   :  { %1701 = vmatprep.mubr.msk.bf16.mxu1 %vm2115_vm0, %v2114_v1  ;;  %v245_v4 = vld [vmem:[#allocation6 + $0x180] sm:$0xff]  ;;  %v1536_v5 = vcombine.high %v249_v2, %v251_v3  ;;  %v1535_v6 = vcombine.low %v249_v2, %v251_v3  ;;  %v252_v16 = vld [vmem:[#allocation6 + $0x1e8] sm:$0xf]  ;;  %vm523_vm3 = vcmask 64512   ;;  %vm685_vm4 = vcmask 1047559  }
  0xe0   :  { %v247_v7 = vld [vmem:[#allocation6 + $0x1a0] sm:$0xff]  ;;  %v246_v17 = vld [vmem:[#allocation6 + $0x188] sm:$0xf]  ;;  %v1537_v18 = vcombine.low %v250_v15, %v252_v16 }
  0xe1   :  { %v1533_v8 = vcombine.high %v245_v4, %v247_v7  ;;  %v241_v9 = vld [vmem:[#allocation6 + $0x140] sm:$0xff]  ;;  %381 = vmatprep.subr.bf16.mxu0 %v1536_v5  ;;  %v1532_v11 = vcombine.low %v245_v4, %v247_v7  ;;  %v248_v19 = vld [vmem:[#allocation6 + $0x1a8] sm:$0xf] }
  0xe2   :  { %v243_v10 = vld [vmem:[#allocation6 + $0x160] sm:$0xff]  ;;  %382 = vmatpush1.bf16.msra.mxu0 %v1535_v6  ;;  %1686 = vmatpush3.bf16.msra.mxu1 %v1537_v18  ;;  %v1534_v23 = vcombine.low %v246_v17, %v248_v19  ;;  %v242_v25 = vld [vmem:[#allocation6 + $0x148] sm:$0xf] }
  0xe3   :  { %383 = vmatprep.subr.bf16.mxu0 %v1533_v8  ;;  %v1530_v12 = vcombine.high %v241_v9, %v243_v10  ;;  %v237_v13 = vld [vmem:[#allocation6 + $0x100] sm:$0xff]  ;;  %v1529_v20 = vcombine.low %v241_v9, %v243_v10  ;;  %1687 = vmatprep.subr.bf16.mxu1 %v2114_v1  ;;  %v244_v26 = vld [vmem:[#allocation6 + $0x168] sm:$0xf] }
  0xe4   :  { %v239_v14 = vld [vmem:[#allocation6 + $0x120] sm:$0xff]  ;;  %v238_v30 = vld [vmem:[#allocation6 + $0x108] sm:$0xf]  ;;  %v1531_v33 = vcombine.low %v242_v25, %v244_v26  ;;  %v587_v25 = vld [vmem:[#allocation6 + $0x1ec] sm:$0xf] }
  0xe5   :  { %v1527_v21 = vcombine.high %v237_v13, %v239_v14  ;;  %v233_v22 = vld [vmem:[#allocation6 + $0xc0] sm:$0xff]  ;;  %v1526_v27 = vcombine.low %v237_v13, %v239_v14  ;;  %v240_v31 = vld [vmem:[#allocation6 + $0x128] sm:$0xf]  ;;  %v584_v26 = vld [vmem:[#allocation6 + $0x18c] sm:$0xf] }
  0xe6   :  { %384 = vmatpush1.bf16.msra.mxu0 %v1532_v11  ;;  %v235_v24 = vld [vmem:[#allocation6 + $0xe0] sm:$0xff]  ;;  %1688 = vmatpush3.bf16.msra.mxu1 %v1534_v23  ;;  %v234_v37 = vld [vmem:[#allocation6 + $0xc8] sm:$0xf]  ;;  %v1528_v40 = vcombine.low %v238_v30, %v240_v31  ;;  %v582_v30 = vld [vmem:[#allocation6 + $0x14c] sm:$0xf] }
  0xe7   :  { %385 = vmatprep.subr.bf16.mxu0 %v1530_v12  ;;  %v229_v28 = vld [vmem:[#allocation6 + $0x80] sm:$0xff]  ;;  %v1524_v32 = vcombine.high %v233_v22, %v235_v24  ;;  %1689 = vmatprep.subr.bf16.mxu1 %v2114_v1  ;;  %v1523_v34 = vcombine.low %v233_v22, %v235_v24  ;;  %v236_v38 = vld [vmem:[#allocation6 + $0xe8] sm:$0xf]  ;;  %v586_v24 = vld [vmem:[#allocation6 + $0x1cc] sm:$0xf] }
  0xe8   :  { %v231_v29 = vld [vmem:[#allocation6 + $0xa0] sm:$0xff]  ;;  %v230_v44 = vld [vmem:[#allocation6 + $0x88] sm:$0xf]  ;;  %v1525_v47 = vcombine.low %v234_v37, %v236_v38  ;;  %v583_v31 = vld [vmem:[#allocation6 + $0x16c] sm:$0xf] }
  0xe9   :  { %v225_v35 = vld [vmem:[#allocation6 + $0x40] sm:$0xff]  ;;  %v1521_v39 = vcombine.high %v229_v28, %v231_v29  ;;  %v1520_v41 = vcombine.low %v229_v28, %v231_v29  ;;  %v232_v45 = vld [vmem:[#allocation6 + $0xa8] sm:$0xf]  ;;  %v585_v28 = vld [vmem:[#allocation6 + $0x1ac] sm:$0xf] }
  0xea   :  { %386 = vmatpush1.bf16.msra.mxu0 %v1529_v20  ;;  %v227_v36 = vld [vmem:[#allocation6 + $0x60] sm:$0xff]  ;;  %1690 = vmatpush3.bf16.msra.mxu1 %v1531_v33  ;;  %v226_v51 = vld [vmem:[#allocation6 + $0x48] sm:$0xf]  ;;  %v1522_v54 = vcombine.low %v230_v44, %v232_v45  ;;  %v1545_v29 = vcombine.low %v584_v26, %v585_v28  ;;  %v580_v33 = vld [vmem:[#allocation6 + $0x10c] sm:$0xf] }
  0xeb   :  { %387 = vmatprep.subr.bf16.mxu0 %v1527_v21  ;;  %1691 = vmatprep.subr.bf16.mxu1 %v2114_v1  ;;  %v221_v42 = vld [vmem:[#allocation6] sm:$0xff]  ;;  %v1518_v46 = vcombine.high %v225_v35, %v227_v36  ;;  %v1517_v50 = vcombine.low %v225_v35, %v227_v36  ;;  %v228_v52 = vld [vmem:[#allocation6 + $0x68] sm:$0xf]  ;;  %v578_v36 = vld [vmem:[#allocation6 + $0xcc] sm:$0xf] }
  0xec   :  { %v223_v43 = vld [vmem:[#allocation6 + $0x20] sm:$0xff]  ;;  %v222_v57 = vld [vmem:[#allocation6 + $0x8] sm:$0xf]  ;;  %v1519_v59 = vcombine.low %v226_v51, %v228_v52  ;;  %v579_v37 = vld [vmem:[#allocation6 + $0xec] sm:$0xf] }
  0xed   :  { %v218_v49 = vld [vmem:[#allocation11] sm:$0xff]  ;;  %v1515_v53 = vcombine.high %v221_v42, %v223_v43  ;;  %v1514_v56 = vcombine.low %v221_v42, %v223_v43  ;;  %v224_v58 = vld [vmem:[#allocation6 + $0x28] sm:$0xf]  ;;  %v1542_v38 = vcombine.low %v578_v36, %v579_v37  ;;  %v574_v42 = vld [vmem:[#allocation6 + $0x4c] sm:$0xf] }
  0xee   :  { %388 = vmatpush1.bf16.msra.mxu0 %v1526_v27  ;;  %1692 = vmatpush3.bf16.msra.mxu1 %v1528_v40  ;;  %v2304_v55 = vadd.f32 %v218_v49, %v217_v48  ;;  %v1516_v61 = vcombine.low %v222_v57, %v224_v58  ;;  %v1546_v27 = vcombine.low %v586_v24, %v587_v25  ;;  %v577_v40 = vld [vmem:[#allocation6 + $0xac] sm:$0xf]  ;;  %v732_v26 = vld [vmem:[#allocation6 + $0x178] sm:$0xff]  ;;  %v727_v28 = vld [vmem:[#allocation6 + $0x130] sm:$0xff] }
  0xef   :  { %389 = vmatprep.subr.bf16.mxu0 %v1524_v32  ;;  %1693 = vmatprep.subr.bf16.mxu1 %v2114_v1  ;;  %v1544_v32 = vcombine.low %v582_v30, %v583_v31  ;;  %v575_v43 = vld [vmem:[#allocation6 + $0x6c] sm:$0xf]  ;;  %v723_v36 = vld [vmem:[#allocation6 + $0xf0] sm:$0xff]  ;;  %v722_v37 = vld [vmem:[#allocation6 + $0xd8] sm:$0xff] }
  0xf0   :  { %v220_v60 = vpack.c.bf16 %v2304_v55, %v2304_v55  ;;  %v1540_v44 = vcombine.low %v574_v42, %v575_v43  ;;  %v572_v49 = vld [vmem:[#allocation6 + $0xc] sm:$0xf]  ;;  %v717_v43 = vld [vmem:[#allocation6 + $0x90] sm:$0xff] }
  0xf2   :  { %390 = vmatpush1.bf16.msra.mxu0 %v1523_v34  ;;  %1694 = vmatpush3.bf16.msra.mxu1 %v1525_v47  ;;  %v581_v34 = vld [vmem:[#allocation6 + $0x12c] sm:$0xf] }
  0xf3   :  { %391 = vmatprep.subr.bf16.mxu0 %v1521_v39  ;;  %1695 = vmatprep.subr.bf16.mxu1 %v2114_v1  ;;  %v1543_v35 = vcombine.low %v580_v33, %v581_v34  ;;  %v576_v39 = vld [vmem:[#allocation6 + $0x8c] sm:$0xf]  ;;  %v728_v33 = vld [vmem:[#allocation6 + $0x138] sm:$0xff]  ;;  %v721_v34 = vld [vmem:[#allocation6 + $0xd0] sm:$0xff] }
  0xf6   :  { %392 = vmatpush1.bf16.msra.mxu0 %v1520_v41  ;;  %1696 = vmatpush3.bf16.msra.mxu1 %v1522_v54  ;;  %v1541_v41 = vcombine.low %v576_v39, %v577_v40 }
  0xf7   :  { %393 = vmatprep.subr.bf16.mxu0 %v1518_v46  ;;  %1697 = vmatprep.subr.bf16.mxu1 %v2114_v1 }
  0xfa   :  { %394 = vmatpush1.bf16.msra.mxu0 %v1517_v50  ;;  %1698 = vmatpush3.bf16.msra.mxu1 %v1519_v59  ;;  %v573_v50 = vld [vmem:[#allocation6 + $0x2c] sm:$0xf] }
  0xfb   :  { %395 = vmatprep.subr.bf16.mxu0 %v1515_v53  ;;  %1699 = vmatprep.subr.bf16.mxu1 %v2114_v1  ;;  %v1539_v51 = vcombine.low %v572_v49, %v573_v50 }
  0xfe   :  { %396 = vmatpush1.bf16.msra.mxu0 %v1514_v56  ;;  %1700 = vmatpush3.bf16.msra.mxu1 %v1516_v61 }
  0xff   :  { %1717 = vmatprep.subr.bf16.mxu0 %v2114_v1  ;;  %1705 = vmatprep.subr.bf16.mxu1 %v2114_v1 }
 0x101   :  { %414 = vmatmul.mubr.bf16.vlgmr.msra.gmra.mxu0 %v220_v60  ;;  %1702 = vmatmul.mubr.bf16.vlgmr.msra.gmra.mxu1 %v220_v60 }
 0x102   :  { %1733 = vmatprep.mubr.msk.bf16.mxu0 %vm2115_vm0, %v2114_v1  ;;  %1707 = vmatprep.mubr.msk.bf16.mxu1 %vm2115_vm0, %v2114_v1 }
 0x103   :  { %1718 = vmatpush3.bf16.msra.mxu0 %v1546_v27  ;;  %v725_v27 = vld [vmem:[#allocation6 + $0x110] sm:$0xff] }
 0x104   :  { %1719 = vmatprep.subr.bf16.mxu0 %v2114_v1  ;;  %v1564_v31 = vcombine.high %v725_v27, %v727_v28  ;;  %v1563_v39 = vcombine.low %v725_v27, %v727_v28  ;;  %v1767_v27 = vld [vmem:[#allocation9 + $0x68] sm:$0xff]  }
 0x105   :  { %v1768_v28 = vld [vmem:[#allocation9 + $0xe8] sm:$0xff]  }
 0x107   :  { %1720 = vmatpush3.bf16.msra.mxu0 %v1545_v29 }
 0x108   :  { %1721 = vmatprep.subr.bf16.mxu0 %v2114_v1 }
 0x10b   :  { %1722 = vmatpush3.bf16.msra.mxu0 %v1544_v32  ;;  %v726_v32 = vld [vmem:[#allocation6 + $0x118] sm:$0xff] }
 0x10c   :  { %1723 = vmatprep.subr.bf16.mxu0 %v2114_v1  ;;  %v1565_v40 = vcombine.low %v726_v32, %v728_v33 }
 0x10f   :  { %1724 = vmatpush3.bf16.msra.mxu0 %v1543_v35  ;;  %v1566_v35 = vcombine.high %v726_v32, %v728_v33  ;;  %v1772_v32 = vld [vmem:[#allocation9 + $0xe0] sm:$0xff]  }
 0x110   :  { %1725 = vmatprep.subr.bf16.mxu0 %v2114_v1  ;;  %v1773_v33 = vld [vmem:[#allocation9 + $0x20] sm:$0xff]  }
 0x113   :  { %1726 = vmatpush3.bf16.msra.mxu0 %v1542_v38  ;;  %v724_v38 = vld [vmem:[#allocation6 + $0xf8] sm:$0xff] }
 0x114   :  { %1727 = vmatprep.subr.bf16.mxu0 %v2114_v1  ;;  %v1562_v42 = vcombine.high %v722_v37, %v724_v38 }
 0x117   :  { %1728 = vmatpush3.bf16.msra.mxu0 %v1541_v41  ;;  %v1560_v41 = vcombine.high %v721_v34, %v723_v36 }
 0x118   :  { %1729 = vmatprep.subr.bf16.mxu0 %v2114_v1 }
 0x11b   :  { %1730 = vmatpush3.bf16.msra.mxu0 %v1540_v44  ;;  %v719_v44 = vld [vmem:[#allocation6 + $0xb0] sm:$0xff] }
 0x11c   :  { %1731 = vmatprep.subr.bf16.mxu0 %v2114_v1  ;;  %v1556_v49 = vcombine.high %v717_v43, %v719_v44 }
 0x11f   :  { %1732 = vmatpush3.bf16.msra.mxu0 %v1539_v51  ;;  %v713_v51 = vld [vmem:[#allocation6 + $0x50] sm:$0xff] }
 0x1c1   :  { %v415_v62 = vpop.f32.mrf.mxu0  ;;  %v456_v5 = vpop.f32.mrf.mxu1 }
 0x1c2   :  { %v462_v63 = vpack.c.bf16 %v415_v62, %v415_v62  ;;  %v522_v8 = vpack.c.bf16 %v456_v5, %v456_v5 }
 0x1c3   :  { %v417_v2 = vpop.f32.mrf.mxu0  ;;  %v1703_v9 = vpop.f32.mrf.mxu1 }
 0x1c4   :  { %v463_v3 = vpack.c.bf16 %v417_v2, %v417_v2  ;;  %v465_v6 = vshrl.u32 %v462_v63, 16  ;;  %v529_v12 = vsel %vm527_vm1, %v522_v8, 0  ;;  %v737_v2 = vld [vmem:[#allocation6 + $0x1d0] sm:$0xff] }
 0x1c5   :  { %v419_v4 = vpop.f32.mrf.mxu0  ;;  %v459_v10 = vpop.f32.mrf.mxu1 }
 0x1c6   :  { %1706 = vmatpush3.bf16.xpose.msra.mxu1 %v463_v3  ;;  %v467_v11 = vrot.slane %v465_v6, 3  ;;  %v739_v3 = vld [vmem:[#allocation6 + $0x1f0] sm:$0xff]  ;;  %v738_v4 = vld [vmem:[#allocation6 + $0x1d8] sm:$0xff] }
 0x1c7   :  { %v420_v7 = vpop.f32.mrf.mxu0  ;;  %1711 = vmatprep.subr.bf16.mxu1 %v2114_v1  ;;  %v1704_v13 = vpop.f32.mrf.mxu1  ;;  %v1575_v5 = vcombine.low %v737_v2, %v739_v3  ;;  %v1576_v6 = vcombine.high %v737_v2, %v739_v3 }
 0x1c8   :  { %v740_v7 = vld [vmem:[#allocation6 + $0x1f8] sm:$0xff]  ;;  %v733_v13 = vld [vmem:[#allocation6 + $0x190] sm:$0xff] }
 0x1c9   :  { %v1577_v8 = vcombine.low %v738_v4, %v740_v7 }
 0x1cd   :  { %1708 = vmatmul.mubr.bf16.vlgmr.msra.gmra.mxu1 %v467_v11 }
 0x1ce   :  { %1712 = vmatpush3.bf16.msra.mxu1 %v529_v12  ;;  %1713 = vmatprep.mubr.msk.bf16.mxu1 %vm2115_vm0, %v2114_v1 }
 0x1cf   :  { %928 = vmatprep.subr.bf16.mxu1 %v1576_v6 }
 0x28d   :  { %v503_v14 = vpop.f32.mrf.mxu1 }
 0x28e   :  { %v510_v15 = vsel %vm509_vm2, %v503_v14, -inf }
 0x28f   :  { %511 = vmax.xlane.f32.xlu0 %v510_v15  ;;  %v1709_v16 = vpop.f32.mrf.mxu1  ;;  %v734_v15 = vld [vmem:[#allocation6 + $0x198] sm:$0xff] }
 0x291   :  { %v506_v17 = vpop.f32.mrf.mxu1 }
 0x292   :  { %v736_v17 = vld [vmem:[#allocation6 + $0x1b8] sm:$0xff] }
 0x293   :  { %v1710_v18 = vpop.f32.mrf.mxu1 }
 0x318   :  { %v512_v19 = vpop.xlane.xlu0 %511 }
 0x319   :  { %v513_v20 = vsub.f32 %v503_v14, %v512_v19  ;;  %v735_v14 = vld [vmem:[#allocation6 + $0x1b0] sm:$0xff]  ;;  %v1573_v19 = vcombine.low %v734_v15, %v736_v17 }
 0x31a   :  { %v1572_v16 = vcombine.high %v733_v13, %v735_v14  ;;  %v1571_v18 = vcombine.low %v733_v13, %v735_v14 }
 0x31b   :  { %v514_v21 = vmul.f32 1.442695, %v513_v20  ;;  %v1574_v20 = vcombine.high %v734_v15, %v736_v17 }
 0x31d   :  { %1791 = vpow2.f32 %v514_v21  ;;  %v729_v21 = vld [vmem:[#allocation6 + $0x150] sm:$0xff] }
 0x32a   :  { %v1792_v22 = vpop.eup %1791 }
 0x32b   :  { %v516_v23 = vsel %vm509_vm2, %v1792_v22, 0.0 }
 0x32c   :  { %517 = vadd.xlane.f32.xlu0 %v516_v23  ;;  %v730_v23 = vld [vmem:[#allocation6 + $0x158] sm:$0xff] }
 0x32d   :  { %v1569_v29 = vcombine.low %v730_v23, %v732_v26  ;;  %v1570_v30 = vcombine.high %v730_v23, %v732_v26  ;;  %v1762_v23 = vld [vmem:[#allocation9 + $0xb8] sm:$0xff]   ;;  %v1766_v26 = vld [vmem:[#allocation9 + $0xb0] sm:$0xff]  }
 0x3b5   :  { %v518_v45 = vpop.xlane.xlu0 %517 }
 0x3b6   :  { %1793 = vrcp.f32 %v518_v45  ;;  %v718_v45 = vld [vmem:[#allocation6 + $0x98] sm:$0xff] }
 0x3c3   :  { %v1794_v46 = vpop.eup %1793 }
 0x3c4   :  { %v520_v47 = vmul.f32 %v1794_v46, %v1792_v22  ;;  %v731_v22 = vld [vmem:[#allocation6 + $0x170] sm:$0xff]  ;;  %v720_v46 = vld [vmem:[#allocation6 + $0xb8] sm:$0xff] }
 0x3c5   :  { %v1567_v24 = vcombine.low %v729_v21, %v731_v22  ;;  %v1568_v25 = vcombine.high %v729_v21, %v731_v22  ;;  %v1558_v50 = vcombine.high %v718_v45, %v720_v46  ;;  %v1760_v21 = vld [vmem:[#allocation9 + $0xf8] sm:$0xff]  }
 0x3c6   :  { %v521_v48 = vpack.c.bf16 %v520_v47, %v520_v47  ;;  %v1559_v47 = vcombine.low %v721_v34, %v723_v36  ;;  %v1761_v22 = vld [vmem:[#allocation9 + $0x38] sm:$0xff]   ;;  %v1774_v34 = vld [vmem:[#allocation9 + $0xa0] sm:$0xff]  }
 0x3c7   :  { %v1776_v36 = vld [vmem:[#allocation9 + $0xd8] sm:$0xff]  }
 0x3c8   :  { %1714 = vmatmul.mubr.msk.bf16.vlgmr.msra.gmra.mxu1 %vm523_vm3, %v521_v48  ;;  %v1561_v48 = vcombine.low %v722_v37, %v724_v38  ;;  %v1777_v37 = vld [vmem:[#allocation9 + $0x18] sm:$0xff]  }
 0x3c9   :  { %960 = vmatprep.mubr.bf16.mxu1 %v2113_v0  ;;  %929 = vmatpush1.bf16.msra.mxu1 %v1575_v5  ;;  %v1778_v38 = vld [vmem:[#allocation9 + $0x98] sm:$0xff]  }
 0x3ca   :  { %930 = vmatprep.subr.bf16.mxu1 %v1572_v16 }
 0x3cd   :  { %931 = vmatpush1.bf16.msra.mxu1 %v1571_v18 }
 0x3ce   :  { %932 = vmatprep.subr.bf16.mxu1 %v1568_v25  ;;  %v1765_v25 = vld [vmem:[#allocation9 + $0x30] sm:$0xff]  }
 0x3d1   :  { %933 = vmatpush1.bf16.msra.mxu1 %v1567_v24  ;;  %v1764_v24 = vld [vmem:[#allocation9 + $0xf0] sm:$0xff]  }
 0x3d2   :  { %934 = vmatprep.subr.bf16.mxu1 %v1564_v31  ;;  %v1771_v31 = vld [vmem:[#allocation9 + $0x60] sm:$0xff]  }
 0x3d5   :  { %935 = vmatpush1.bf16.msra.mxu1 %v1563_v39  ;;  %v1779_v39 = vld [vmem:[#allocation9 + $0x50] sm:$0xff]  }
 0x3d6   :  { %936 = vmatprep.subr.bf16.mxu1 %v1560_v41  ;;  %v1781_v41 = vld [vmem:[#allocation9 + $0x10] sm:$0xff]  }
 0x3d9   :  { %937 = vmatpush1.bf16.msra.mxu1 %v1559_v47  ;;  %v1787_v47 = vld [vmem:[#allocation9 + $0x40] sm:$0xff]  }
 0x3da   :  { %938 = vmatprep.subr.bf16.mxu1 %v1556_v49  ;;  %v1789_v49 = vld [vmem:[#allocation9] sm:$0xff]  }
 0x488   :  { %v565_v52 = vpop.f32.mrf.mxu1 }
 0x489   :  { %v571_v53 = vpack.c.bf16 %v565_v52, %v565_v52  ;;  %v715_v52 = vld [vmem:[#allocation6 + $0x70] sm:$0xff] }
 0x48a   :  { %v1715_v54 = vpop.f32.mrf.mxu1 }
 0x48b   :  { %1734 = vmatmul.mubr.bf16.vlgmr.msra.gmra.mxu0 %v571_v53  ;;  %v714_v53 = vld [vmem:[#allocation6 + $0x58] sm:$0xff] }
 0x48c   :  { %v568_v56 = vpop.f32.mrf.mxu1  ;;  %1001 = vmatprep.mubr.bf16.mxu0 %v2113_v0  ;;  %v1578_v0 = vcombine.high %v738_v4, %v740_v7  ;;  %v716_v54 = vld [vmem:[#allocation6 + $0x78] sm:$0xff] }
 0x48d   :  { %v1555_v56 = vcombine.low %v717_v43, %v719_v44  ;;  %v1553_v2 = vcombine.low %v714_v53, %v716_v54  ;;  %v1783_v43 = vld [vmem:[#allocation9 + $0x48] sm:$0xff]  }
 0x48e   :  { %v1716_v1 = vpop.f32.mrf.mxu1  ;;  %969 = vmatprep.subr.bf16.mxu0 %v1578_v0  ;;  %v1784_v44 = vld [vmem:[#allocation9 + $0xc8] sm:$0xff]  }
 0x48f   :  { %970 = vmatpush1.bf16.msra.mxu0 %v1577_v8  ;;  %v1557_v1 = vcombine.low %v718_v45, %v720_v46  ;;  %939 = vmatpush1.bf16.msra.mxu1 %v1555_v56  ;;  %v1785_v45 = vld [vmem:[#allocation9 + $0x8] sm:$0xff]   ;;  %v741_v56 = vld [vmem:[%s2353_s4] sm:$0xf]  ;;  %s2116_s4 = smov [#allocation12]  }
 0x490   :  { %971 = vmatprep.subr.bf16.mxu0 %v1574_v20  ;;  %v1759_v20 = vld [vmem:[#allocation9 + $0x78] sm:$0xff]   ;;  %v1786_v46 = vld [vmem:[#allocation9 + $0x88] sm:$0xff]   ;;  %s1418_s12 = sshll.u32 %s2116_s4, 4  ;;  %s1419_s12 = int_to_ptr.vmem [resolvable:$true] %s1418_s12 }
 0x491   :  { %s2051_s15 = scalar_lea.vmem %s1419_s12, 16  ;;  %s2055_s25 = scalar_lea.vmem %s1419_s12, 32 }
 0x492   :  { %p2052_p11 = scmp.ne.s32.totalorder %s1419_s12, %s2051_s15  ;;  %p2056_p12 = scmp.lt.s32.totalorder %s1419_s12, %s1419_s12 }
 0x493   :  { %972 = vmatpush1.bf16.msra.mxu0 %v1573_v19  ;;  %p2057_p13 = scmp.lt.s32.totalorder %s2055_s25, %s2051_s15 }
 0x494   :  { %973 = vmatprep.subr.bf16.mxu0 %v1570_v30  ;;  %v1770_v30 = vld [vmem:[#allocation9 + $0xa8] sm:$0xff]  }
 0x495   :  { %p2058_p0 = por %p2057_p13, %p2056_p12 }
 0x497   :  { %974 = vmatpush1.bf16.msra.mxu0 %v1569_v29  ;;  %v1769_v29 = vld [vmem:[#allocation9 + $0x28] sm:$0xff]   ;;  %p2059_p1 = pnand %p2058_p0, %p2052_p11 }
 0x498   :  { %975 = vmatprep.subr.bf16.mxu0 %v1566_v35  ;;  %v1775_v35 = vld [vmem:[#allocation9 + $0x58] sm:$0xff]  }
 0x49b   :  { %976 = vmatpush1.bf16.msra.mxu0 %v1565_v40  ;;  %v1780_v40 = vld [vmem:[#allocation9 + $0xd0] sm:$0xff]  }
 0x49c   :  { %977 = vmatprep.subr.bf16.mxu0 %v1562_v42  ;;  %v1782_v42 = vld [vmem:[#allocation9 + $0x90] sm:$0xff]  }
 0x49f   :  { %978 = vmatpush1.bf16.msra.mxu0 %v1561_v48  ;;  %v1788_v48 = vld [vmem:[#allocation9 + $0xc0] sm:$0xff]  }
 0x4a0   :  { %979 = vmatprep.subr.bf16.mxu0 %v1558_v50  ;;  %v1790_v50 = vld [vmem:[#allocation9 + $0x80] sm:$0xff]  }
 0x4a3   :  { %980 = vmatpush1.bf16.msra.mxu0 %v1557_v1 }
 0x54b   :  { %v670_v57 = vpop.f32.mrf.mxu0 }
 0x54c   :  { %v682_v58 = vrot.slane %v670_v57, 1  ;;  %v1552_v57 = vcombine.high %v713_v51, %v715_v52 }
 0x54d   :  { %v1735_v59 = vpop.f32.mrf.mxu0 }
 0x54e   :  { %v684_v60 = vadd.f32 %v682_v58, %v2304_v55  ;;  %v1554_v58 = vcombine.high %v714_v53, %v716_v54  ;;  %v709_v59 = vld [vmem:[#allocation6 + $0x10] sm:$0xff]  ;;  %940 = vmatprep.subr.bf16.mxu1 %v1552_v57 }
 0x54f   :  { %v673_v61 = vpop.f32.mrf.mxu0 }
 0x550   :  { %v686_v62 = vsel %vm685_vm4, %v684_v60, 0.0  ;;  %v710_v61 = vld [vmem:[#allocation6 + $0x18] sm:$0xff]  ;;  %981 = vmatprep.subr.bf16.mxu0 %v1554_v58 }
 0x551   :  { %687 = vadd.xlane.f32.xlu1 %v686_v62  ;;  %v1736_v63 = vpop.f32.mrf.mxu0  ;;  %v712_v62 = vld [vmem:[#allocation6 + $0x38] sm:$0xff]  ;;  %982 = vmatpush1.bf16.msra.mxu0 %v1553_v2 }
 0x552   :  { %v1551_v63 = vcombine.low %v713_v51, %v715_v52  ;;  %v1550_v4 = vcombine.high %v710_v61, %v712_v62  ;;  %v1549_v6 = vcombine.low %v710_v61, %v712_v62  ;;  %v908_v51 = vlaneseq }
 0x554   :  { %941 = vmatpush1.bf16.msra.mxu1 %v1551_v63  ;;  %983 = vmatprep.subr.bf16.mxu0 %v1550_v4  ;;  %v909_v52 = vshrl.u32 %v908_v51, 7 }
 0x555   :  { %984 = vmatpush1.bf16.msra.mxu0 %v1549_v6 }
 0x556   :  { %1663 = vmatprep.subr.bf16.mxu0 %v1760_v21  ;;  %v910_v53 = vsub.s32 0, %v909_v52  ;;  %v918_v54 = vsub.s32 2, %v909_v52  ;;  %v914_v1 = vsub.s32 1, %v909_v52  ;;  %v922_v57 = vsub.s32 3, %v909_v52 }
 0x558   :  { %v911_v58 = vrot.slane %v741_v56, %v910_v53  ;;  %v923_v61 = vrot.slane %v741_v56, %v922_v57  ;;  %v680_v53 = vld [vmem:[#allocation11 + $0xc] sm:$0x1] }
 0x5da   :  { %v688_v9 = vpop.xlane.xlu1 %687 }
 0x5db   :  { %v690_v10 = vmul.f32 0.0078125, %v688_v9  ;;  %v676_v9 = vld [vmem:[#allocation11 + $0x8] sm:$0x1] }
 0x5dd   :  { %v2330_v55 = vsub.f32 %v684_v60, %v690_v10  ;;  %v711_v60 = vld [vmem:[#allocation6 + $0x30] sm:$0xff]  ;;  %v677_v10 = vld [vmem:[#allocation11 + $0x9] sm:$0x1] }
 0x5de   :  { %v1548_v3 = vcombine.high %v709_v59, %v711_v60  ;;  %v1547_v5 = vcombine.low %v709_v59, %v711_v60  ;;  %v705_v14 = vrot.slane %v677_v10, 1  ;;  %v919_v59 = vrot.slane %v741_v56, %v918_v54 }
 0x5df   :  { %v692_v11 = vmul.f32 %v2330_v55, %v2330_v55  ;;  %v915_v60 = vrot.slane %v741_v56, %v914_v1 }
 0x5e0   :  { %942 = vmatprep.subr.bf16.mxu1 %v1548_v3 }
 0x5e1   :  { %v693_v12 = vsel %vm685_vm4, %v692_v11, 0.0  ;;  %943 = vmatpush1.bf16.msra.mxu1 %v1547_v5  ;;  %v701_v11 = vrot.slane %v676_v9, 1 }
 0x5e2   :  { %694 = vadd.xlane.f32.xlu1 %v693_v12  ;;  %1641 = vmatprep.subr.bf16.mxu1 %v1759_v20 }
 0x66b   :  { %v695_v7 = vpop.xlane.xlu1 %694 }
 0x66c   :  { %v696_v8 = vmul.f32 0.0078125, %v695_v7 }
 0x66e   :  { %v697_v0 = vadd.f32 1e-05, %v696_v8 }
 0x670   :  { %1795 = vrsqrt.f32 %v697_v0 }
 0x67d   :  { %v1796_v12 = vpop.eup %1795 }
 0x67e   :  { %v699_v13 = vmul.f32 %v1796_v12, %v2330_v55  ;;  %v1763_v55 = vld [vmem:[#allocation9 + $0x70] sm:$0xff]  }
 0x680   :  { %v703_v15 = vmul.f32 %v701_v11, %v699_v13 }
 0x682   :  { %v2336_v16 = vadd.f32 %v705_v14, %v703_v15 }
 0x684   :  { %v708_v17 = vpack.c.bf16 %v2336_v16, %v2336_v16 }
 0x686   :  { %v743_v18 = vshrl.u32 %v708_v17, 16 }
 0x688   :  { %v745_v19 = vrot.slane %v743_v18, 3 }
 0x68a   :  { %961 = vmatmul.mubr.bf16.vlgmr.msra.gmra.mxu1 %v745_v19  ;;  %1002 = vmatmul.mubr.bf16.vlgmr.msra.gmra.mxu0 %v745_v19 }
 0x68b   :  { %1642 = vmatpush3.bf16.msra.mxu1 %v1761_v22  ;;  %1664 = vmatpush3.bf16.msra.mxu0 %v1762_v23 }
 0x68c   :  { %1643 = vmatprep.subr.bf16.mxu1 %v1763_v55  ;;  %1665 = vmatprep.subr.bf16.mxu0 %v1764_v24 }
 0x68f   :  { %1644 = vmatpush3.bf16.msra.mxu1 %v1765_v25  ;;  %1666 = vmatpush3.bf16.msra.mxu0 %v1766_v26 }
 0x690   :  { %1645 = vmatprep.subr.bf16.mxu1 %v1767_v27  ;;  %1667 = vmatprep.subr.bf16.mxu0 %v1768_v28 }
 0x693   :  { %1646 = vmatpush3.bf16.msra.mxu1 %v1769_v29  ;;  %1668 = vmatpush3.bf16.msra.mxu0 %v1770_v30 }
 0x694   :  { %1647 = vmatprep.subr.bf16.mxu1 %v1771_v31  ;;  %1669 = vmatprep.subr.bf16.mxu0 %v1772_v32 }
 0x697   :  { %1648 = vmatpush3.bf16.msra.mxu1 %v1773_v33  ;;  %1670 = vmatpush3.bf16.msra.mxu0 %v1774_v34 }
 0x698   :  { %1649 = vmatprep.subr.bf16.mxu1 %v1775_v35  ;;  %1671 = vmatprep.subr.bf16.mxu0 %v1776_v36 }
 0x69b   :  { %1650 = vmatpush3.bf16.msra.mxu1 %v1777_v37  ;;  %1672 = vmatpush3.bf16.msra.mxu0 %v1778_v38 }
 0x69c   :  { %1651 = vmatprep.subr.bf16.mxu1 %v1779_v39  ;;  %1673 = vmatprep.subr.bf16.mxu0 %v1780_v40 }
 0x69f   :  { %1652 = vmatpush3.bf16.msra.mxu1 %v1781_v41  ;;  %1674 = vmatpush3.bf16.msra.mxu0 %v1782_v42 }
 0x6a0   :  { %1653 = vmatprep.subr.bf16.mxu1 %v1783_v43  ;;  %1675 = vmatprep.subr.bf16.mxu0 %v1784_v44 }
 0x6a3   :  { %1654 = vmatpush3.bf16.msra.mxu1 %v1785_v45  ;;  %1676 = vmatpush3.bf16.msra.mxu0 %v1786_v46 }
 0x6a4   :  { %1655 = vmatprep.subr.bf16.mxu1 %v1787_v47  ;;  %1677 = vmatprep.subr.bf16.mxu0 %v1788_v48 }
 0x6a7   :  { %1656 = vmatpush3.bf16.msra.mxu1 %v1789_v49  ;;  %1678 = vmatpush3.bf16.msra.mxu0 %v1790_v50 }
 0x74a   :  { %v962_v62 = vpop.f32.mrf.mxu1  ;;  %v1003_v63 = vpop.f32.mrf.mxu0 }
 0x74b   :  { %v963_v2 = vadd.f32 %v962_v62, %v911_v58  ;;  %v1004_v3 = vadd.f32 %v1003_v63, %v919_v59 }
 0x74c   :  { %v964_v4 = vpop.f32.mrf.mxu1  ;;  %v1005_v5 = vpop.f32.mrf.mxu0 }
 0x74d   :  { %v1010_v6 = vmul.f32 %v963_v2, %v963_v2  ;;  %v1012_v7 = vmul.f32 %v1004_v3, %v1004_v3  ;;  %v965_v8 = vadd.f32 %v964_v4, %v915_v60  ;;  %v1006_v0 = vadd.f32 %v1005_v5, %v923_v61 }
 0x74e   :  { %v966_v9 = vpop.f32.mrf.mxu1  ;;  %v1007_v10 = vpop.f32.mrf.mxu0 }
 0x74f   :  { %v1014_v11 = vmul.f32 %v1010_v6, %v963_v2  ;;  %v1016_v12 = vmul.f32 %v1012_v7, %v1004_v3  ;;  %v1011_v13 = vmul.f32 %v965_v8, %v965_v8  ;;  %v1013_v14 = vmul.f32 %v1006_v0, %v1006_v0 }
 0x750   :  { %v967_v15 = vpop.f32.mrf.mxu1  ;;  %v1008_v17 = vpop.f32.mrf.mxu0 }
 0x751   :  { %v1018_v18 = vmul.f32 0.044715, %v1014_v11  ;;  %v1020_v19 = vmul.f32 0.044715, %v1016_v12  ;;  %v1015_v20 = vmul.f32 %v1011_v13, %v965_v8  ;;  %v1017_v21 = vmul.f32 %v1013_v14, %v1006_v0  ;;  %v678_v12 = vld [vmem:[#allocation11 + $0xa] sm:$0x1] }
 0x752   :  { %v679_v13 = vld [vmem:[#allocation11 + $0xb] sm:$0x1]  ;;  %v1404_v14 = vrot.slane %v678_v12, 1 }
 0x753   :  { %v1022_v22 = vadd.f32 %v1018_v18, %v963_v2  ;;  %v1024_v23 = vadd.f32 %v1020_v19, %v1004_v3  ;;  %v1019_v55 = vmul.f32 0.044715, %v1015_v20  ;;  %v1021_v24 = vmul.f32 0.044715, %v1017_v21 }
 0x755   :  { %v1026_v25 = vmul.f32 0.7978846, %v1022_v22  ;;  %v1028_v26 = vmul.f32 0.7978846, %v1024_v23  ;;  %v1023_v27 = vadd.f32 %v1019_v55, %v965_v8  ;;  %v1025_v28 = vadd.f32 %v1021_v24, %v1006_v0 }
 0x757   :  { %1797 = vtanh.f32 %v1026_v25  ;;  %v1027_v29 = vmul.f32 0.7978846, %v1023_v27  ;;  %v1029_v30 = vmul.f32 0.7978846, %v1025_v28 }
 0x758   :  { %1799 = vtanh.f32 %v1028_v26 }
 0x759   :  { %1801 = vtanh.f32 %v1027_v29 }
 0x75a   :  { %1803 = vtanh.f32 %v1029_v30 }
 0x764   :  { %v1798_v31 = vpop.eup %1797 }
 0x765   :  { %v1800_v32 = vpop.eup %1799  ;;  %v1034_v33 = vadd.f32 1.0, %v1798_v31 }
 0x766   :  { %v1802_v34 = vpop.eup %1801  ;;  %v1036_v35 = vadd.f32 1.0, %v1800_v32 }
 0x767   :  { %v1804_v36 = vpop.eup %1803  ;;  %v1035_v37 = vadd.f32 1.0, %v1802_v34  ;;  %v1038_v38 = vmul.f32 0.5, %v1034_v33 }
 0x768   :  { %v1037_v39 = vadd.f32 1.0, %v1804_v36  ;;  %v1040_v40 = vmul.f32 0.5, %v1036_v35 }
 0x769   :  { %v1039_v41 = vmul.f32 0.5, %v1035_v37  ;;  %v1042_v43 = vmul.f32 %v1038_v38, %v963_v2 }
 0x76a   :  { %v1041_v42 = vmul.f32 0.5, %v1037_v39  ;;  %v1044_v45 = vmul.f32 %v1040_v40, %v1004_v3 }
 0x76b   :  { %v1043_v44 = vmul.f32 %v1039_v41, %v965_v8  ;;  %v1046_v49 = vpack.c.bf16 %v1042_v43, %v1042_v43 }
 0x76c   :  { %v1045_v46 = vmul.f32 %v1041_v42, %v1006_v0  ;;  %v1048_v50 = vpack.c.bf16 %v1044_v45, %v1044_v45 }
 0x76d   :  { %v1047_v47 = vpack.c.bf16 %v1043_v44, %v1043_v44 }
 0x76e   :  { %v1049_v48 = vpack.c.bf16 %v1045_v46, %v1045_v46 }
 0x76f   :  { %1338 = vmatprep.mubr.bf16.mxu1 %v1047_v47 }
 0x770   :  { %1378 = vmatprep.mubr.bf16.mxu0 %v1049_v48  ;;  %1339 = vmatmul.mubr.bf16.vlgmr.msra.gmra.mxu1 %v1046_v49 }
 0x771   :  { %1379 = vmatmul.mubr.bf16.vlgmr.msra.gmra.mxu0 %v1048_v50 }
 0x830   :  { %v1657_v51 = vpop.f32.mrf.mxu1 }
 0x831   :  { %v1679_v52 = vpop.f32.mrf.mxu0 }
 0x832   :  { %v1658_v54 = vpop.f32.mrf.mxu1 }
 0x833   :  { %v1659_v56 = vadd.f32 %v1658_v54, %v1657_v51  ;;  %v1680_v1 = vpop.f32.mrf.mxu0 }
 0x834   :  { %v1660_v57 = vpop.f32.mrf.mxu1  ;;  %v1681_v59 = vadd.f32 %v1680_v1, %v1679_v52 }
 0x835   :  { %v1341_v58 = vadd.f32 %v1659_v56, %v680_v53  ;;  %v1682_v60 = vpop.f32.mrf.mxu0 }
 0x836   :  { %v1661_v61 = vpop.f32.mrf.mxu1 }
 0x837   :  { %v1381_v62 = vadd.f32 %v1681_v59, %v1341_v58  ;;  %v1683_v63 = vpop.f32.mrf.mxu0 }
 0x839   :  { %v1387_v2 = vrot.slane %v1381_v62, 1 }
 0x83b   :  { %v1389_v3 = vadd.f32 %v1387_v2, %v2336_v16  ;;  %v1408_v16 = vrot.slane %v679_v13, 1 }
 0x83d   :  { %v1390_v4 = vsel %vm685_vm4, %v1389_v3, 0.0 }
 0x83e   :  { %1391 = vadd.xlane.f32.xlu0 %v1390_v4 }
 0x8c7   :  { %v1392_v5 = vpop.xlane.xlu0 %1391 }
 0x8c8   :  { %v1393_v6 = vmul.f32 0.0078125, %v1392_v5 }
 0x8ca   :  { %v1394_v7 = vsub.f32 %v1389_v3, %v1393_v6 }
 0x8cc   :  { %v1395_v8 = vmul.f32 %v1394_v7, %v1394_v7 }
 0x8ce   :  { %v1396_v0 = vsel %vm685_vm4, %v1395_v8, 0.0 }
 0x8cf   :  { %1397 = vadd.xlane.f32.xlu1 %v1396_v0 }
 0x958   :  { %v1398_v9 = vpop.xlane.xlu1 %1397 }
 0x959   :  { %v1399_v10 = vmul.f32 0.0078125, %v1398_v9 }
 0x95b   :  { %v1400_v11 = vadd.f32 1e-05, %v1399_v10 }
 0x95d   :  { %1805 = vrsqrt.f32 %v1400_v11 }
 0x96a   :  { %v1806_v15 = vpop.eup %1805 }
 0x96b   :  { %v1402_v17 = vmul.f32 %v1806_v15, %v1394_v7 }
 0x96d   :  { %v1406_v18 = vmul.f32 %v1404_v14, %v1402_v17 }
 0x96f   :  { %v1410_v19 = vadd.f32 %v1408_v16, %v1406_v18 }
 0x971   :  { %1411 = vst [vmem:[#allocation12 - $0x7] sm:$0x80] %v1410_v19 }
 0x972   :  { %2062 = shalt.err (!%p2059_p1)
}
 0x973   :  { %1421 = dma.vmem_to_hbm [thread:$0]  %s1419_s12, 16, %s2355_s6, [#allocation8]  }
 0x974   :  { %2093 = dma.done.wait [#allocation8], 16  }
 0x975   :  { %2094 = vsyncadd [#allocation8], 4294967280 }
 0x976   :  { %1425 = vsyncpa [#allocation7], 1 }
 0x977   :  { %1426 = vsyncpa [#allocation10], 1 }
 0x978   :  { %1427 = vsyncpa [#allocation8], 1 }
 0x979   :  { %1428 = vsyncmov [#allocation3] }
 0x97c   :  { %s1429_s13 = vpop.sfrf %1428 }
 0x97d   :  { %p1611_p2 = scmp.ne.s32.totalorder %s1429_s13, 0 }
 0x97f   :  { %1433 = shalt.err (%p1611_p2)  }
 0x980   :  { %1435 = vsyncmov [#allocation3 + $0x1] }
 0x983   :  { %s1436_s14 = vpop.sfrf %1435 }
 0x984   :  { %p1612_p3 = scmp.ne.s32.totalorder %s1436_s14, 0 }
 0x986   :  { %1440 = shalt.err (%p1612_p3)  }
 0x987   :  { %1442 = vsyncmov [#allocation3 + $0x2] }
 0x98a   :  { %s1443_s3 = vpop.sfrf %1442 }
 0x98b   :  { %p1613_p4 = scmp.ne.s32.totalorder %s1443_s3, 0 }
 0x98d   :  { %1447 = shalt.err (%p1613_p4)  }
 0x98e   :  { %1449 = vsyncmov [#allocation3 + $0x3] }
 0x991   :  { %s1450_s5 = vpop.sfrf %1449 }
 0x992   :  { %p1614_p5 = scmp.ne.s32.totalorder %s1450_s5, 0 }
 0x994   :  { %1454 = shalt.err (%p1614_p5)  }
 0x995   :  { %1456 = vsyncmov [#allocation3 + $0x4] }
 0x998   :  { %s1457_s6 = vpop.sfrf %1456 }
 0x999   :  { %p1615_p6 = scmp.ne.s32.totalorder %s1457_s6, 0 }
 0x99b   :  { %1461 = shalt.err (%p1615_p6)  }
 0x99c   :  { %1463 = vsyncmov [#allocation3 + $0x5] }
 0x99f   :  { %s1464_s16 = vpop.sfrf %1463 }
 0x9a0   :  { %p1616_p7 = scmp.ne.s32.totalorder %s1464_s16, 0 }
 0x9a2   :  { %1468 = shalt.err (%p1616_p7)  }
 0x9a3   :  { %1470 = vsyncmov [#allocation3 + $0x6] }
 0x9a6   :  { %s1471_s17 = vpop.sfrf %1470 }
 0x9a7   :  { %p1617_p8 = scmp.ne.s32.totalorder %s1471_s17, 0 }
 0x9a9   :  { %1475 = shalt.err (%p1617_p8)  }
 0x9aa   :  { %1477 = vsyncmov [#allocation3 + $0x7] }
 0x9ad   :  { %s1478_s18 = vpop.sfrf %1477 }
 0x9ae   :  { %p1618_p9 = scmp.ne.s32.totalorder %s1478_s18, 0 }
 0x9b0   :  { %1482 = shalt.err (%p1618_p9)  }

</bundles_post_ra>
